<compile_context>
chip_gen: v7x
topology: tpu7x:2x2x1
jax: 0.10.0
libtpu: 0.0.40
codegen_flags: <defaults>
</compile_context>

<pallas_src>
import jax
import jax.numpy as jnp
from jax import lax
from jax.experimental import pallas as pl
from jax.experimental.pallas import tpu as pltpu


# ----------------------------------------------------------------------------
# Pallas kernel: whole forward pass for one batch sample per grid step.
# ----------------------------------------------------------------------------
def _resnetv2_kernel(x_ref, s0_ref, b0_ref, w1_ref, s1_ref, b1_ref,
                     w23_ref, b23_ref, out_ref):
    H = x_ref.shape[1]
    W = x_ref.shape[2]
    C = x_ref.shape[3]
    M = H * W

    x = x_ref[0].reshape(M, C)                      # (M, C) f32, residual input

    # --- preprocess: folded BatchNorm2d + ReLU (f32 elementwise) -------------
    t = jnp.maximum(x * s0_ref[...] + b0_ref[...], 0.0)

    # --- conv1: 1x1 conv (bias=False) + folded BN + ReLU ---------------------
    # bf16 operands on the MXU, f32 accumulation.
    t = jnp.dot(t.astype(jnp.bfloat16), w1_ref[...],
                preferred_element_type=jnp.float32)
    t = jnp.maximum(t * s1_ref[...] + b1_ref[...], 0.0)          # (M, C) f32

    # --- conv2 (3x3, pad=1, no bias) + BN2 + conv3 (1x1 + bias), all folded --
    # im2col along K: build (M, 9C) patches, single matmul with w23 = (9C, C).
    #
    # Horizontal (W) neighbours: one sublane roll each + boundary mask.
    w_pos = lax.broadcasted_iota(jnp.int32, (H, W, C), 1).reshape(M, C)
    zeros = jnp.zeros((M, C), jnp.float32)
    t_e = jnp.where(w_pos < W - 1, pltpu.roll(t, shift=M - 1, axis=0), zeros)  # t[h, w+1]
    t_w = jnp.where(w_pos >= 1,    pltpu.roll(t, shift=1,     axis=0), zeros)  # t[h, w-1]

    # Vertical (H) neighbours: row shifts by +-W are tile-aligned (W % 8 == 0)
    # slices along the sublane axis plus a zero slab -- no XLU work needed.
    zrow = jnp.zeros((W, C), jnp.float32)

    def up(a):      # value at (h-1, w), zero at h == 0
        return jnp.concatenate([zrow, a[:M - W]], axis=0)

    def down(a):    # value at (h+1, w), zero at h == H-1
        return jnp.concatenate([a[W:], zrow], axis=0)

    # Chunk order matches w2.reshape(9*C, C): kh major, then kw, then cin.
    patches = jnp.concatenate(
        [up(t_w),   up(t),   up(t_e),       # kh = 0  (dh = -1)
         t_w,       t,       t_e,           # kh = 1  (dh =  0)
         down(t_w), down(t), down(t_e)],    # kh = 2  (dh = +1)
        axis=1)                             # (M, 9C)

    y = jnp.dot(patches.astype(jnp.bfloat16), w23_ref[...],
                preferred_element_type=jnp.float32) + b23_ref[...]

    # --- residual add (f32) ---------------------------------------------------
    out_ref[0] = (y + x).reshape(H, W, C)


# ----------------------------------------------------------------------------
# Wrapper
# ----------------------------------------------------------------------------
def resnetv2_block(x_nhwc, params):
    """x_nhwc: (N, H, W, C) float32.  params: dict of folded-BN params."""
    N, H, W, C = x_nhwc.shape

    # Fold BN2 and conv3 into the 3x3 conv (all linear, exact up to rounding):
    #   y = ((patches @ w2_flat) * s2 + b2) @ w3 + b3
    #     =  patches @ (w2_flat @ (diag(s2) @ w3)) + (b2 @ w3 + b3)
    w2_flat = params["w2"].reshape(9 * C, C)                    # (9C, C) f32
    w23 = w2_flat @ (params["s2"].reshape(C, 1) * params["w3"])  # (9C, C) f32
    b23 = params["b2"] @ params["w3"] + params["b3"]             # (1, C)  f32

    const = lambda shape: pl.BlockSpec(shape, lambda n: (0,) * len(shape))

    grid_spec = pltpu.PrefetchScalarGridSpec(
        num_scalar_prefetch=0,
        grid=(N,),
        in_specs=[
            pl.BlockSpec((1, H, W, C), lambda n: (n, 0, 0, 0)),  # x
            const((1, C)),            # s0
            const((1, C)),            # b0
            const((C, C)),            # w1 (Cin, Cout), bf16
            const((1, C)),            # s1
            const((1, C)),            # b1
            const((9 * C, C)),        # w23 folded 3x3+BN2+1x1 weight, bf16
            const((1, C)),            # b23 folded bias, f32
        ],
        out_specs=pl.BlockSpec((1, H, W, C), lambda n: (n, 0, 0, 0)),
    )

    return pl.pallas_call(
        _resnetv2_kernel,
        out_shape=jax.ShapeDtypeStruct((N, H, W, C), jnp.float32),
        grid_spec=grid_spec,
        compiler_params=pltpu.CompilerParams(
            dimension_semantics=("parallel",)),
    )(x_nhwc,
      params["s0"], params["b0"],
      params["w1"].astype(jnp.bfloat16),
      params["s1"], params["b1"],
      w23.astype(jnp.bfloat16),
      b23)


# ----------------------------------------------------------------------------
# Deterministic parameter construction (BN folded: scale = g/sqrt(v+eps),
# bias = b - m*scale).  Conv2DBnActivation = Conv2d(bias=False) -> BN -> act.
# ----------------------------------------------------------------------------
def make_params(key, C):
    ks = jax.random.split(key, 16)
    eps = 1e-5

    def bn(kg, kb, km, kv):
        g = jax.random.normal(kg, (C,), jnp.float32) * 0.1 + 1.0
        b = jax.random.normal(kb, (C,), jnp.float32) * 0.1
        m = jax.random.normal(km, (C,), jnp.float32) * 0.1
        v = jax.random.uniform(kv, (C,), jnp.float32, 0.5, 1.5)
        s = g / jnp.sqrt(v + eps)
        return s.reshape(1, C), (b - m * s).reshape(1, C)

    s0, b0 = bn(ks[0], ks[1], ks[2], ks[3])
    s1, b1 = bn(ks[4], ks[5], ks[6], ks[7])
    s2, b2 = bn(ks[8], ks[9], ks[10], ks[11])

    w1 = jax.random.normal(ks[12], (C, C), jnp.float32) * 0.1          # 1x1, (Cin, Cout)
    w2 = jax.random.normal(ks[13], (3, 3, C, C), jnp.float32) * 0.05   # 3x3, HWIO
    w3 = jax.random.normal(ks[14], (C, C), jnp.float32) * 0.1          # 1x1, (Cin, Cout)
    b3 = jax.random.normal(ks[15], (C,), jnp.float32).reshape(1, C) * 0.1

    return dict(s0=s0, b0=b0, w1=w1, s1=s1, b1=b1,
                w2=w2, s2=s2, b2=b2, w3=w3, b3=b3)


# ----------------------------------------------------------------------------
# Pure-JAX reference (NHWC, f32) for correctness checking.
# ----------------------------------------------------------------------------
def reference_forward(x, p):
    dn = ("NHWC", "HWIO", "NHWC")
    t = jnp.maximum(x * p["s0"] + p["b0"], 0.0)
    t = lax.conv_general_dilated(t, p["w1"].reshape(1, 1, *p["w1"].shape),
                                 (1, 1), "VALID", dimension_numbers=dn)
    t = jnp.maximum(t * p["s1"] + p["b1"], 0.0)
    t = lax.conv_general_dilated(t, p["w2"], (1, 1), "SAME",
                                 dimension_numbers=dn)
    t = t * p["s2"] + p["b2"]
    t = lax.conv_general_dilated(t, p["w3"].reshape(1, 1, *p["w3"].shape),
                                 (1, 1), "VALID", dimension_numbers=dn)
    t = t + p["b3"]
    return t + x


if __name__ == "__main__":
    N, C, H, W = 2, 32, 16, 16
    key = jax.random.PRNGKey(0)
    kx, kp = jax.random.split(key)

    # PyTorch-convention input is NCHW; convert to NHWC for the kernel.
    x_nchw = jax.random.normal(kx, (N, C, H, W), jnp.float32)
    x_nhwc = jnp.transpose(x_nchw, (0, 2, 3, 1))

    params = make_params(kp, C)

    out = resnetv2_block(x_nhwc, params)
    out = jax.block_until_ready(out)

    ref = reference_forward(x_nhwc, params)
    # bf16 matmul operands -> looser tolerance than the f32-only version.
    err = float(jnp.max(jnp.abs(out - ref)))
    assert jnp.allclose(out, ref, atol=5e-2, rtol=5e-2), err

    print("KERNEL_OK")
</pallas_src>

<mosaic_0001>
module attributes {stable_mosaic.version = 11 : i64} {
  func.func @_resnetv2_kernel(%arg0: i32, %arg1: memref<1x16x16x32xf32, #tpu.memory_space<vmem>>, %arg2: memref<1x32xf32, #tpu.memory_space<vmem>>, %arg3: memref<1x32xf32, #tpu.memory_space<vmem>>, %arg4: memref<32x32xbf16, #tpu.memory_space<vmem>>, %arg5: memref<1x32xf32, #tpu.memory_space<vmem>>, %arg6: memref<1x32xf32, #tpu.memory_space<vmem>>, %arg7: memref<288x32xbf16, #tpu.memory_space<vmem>>, %arg8: memref<1x32xf32, #tpu.memory_space<vmem>>, %arg9: memref<1x16x16x32xf32, #tpu.memory_space<vmem>>) attributes {dimension_semantics = [#tpu.dimension_semantics<parallel>], iteration_bounds = array<i64: 2>, scalar_prefetch = 0 : i64, scratch_operands = 0 : i64, tpu.core_type = #tpu.core_type<tc>, window_params = [{transform_indices = @transform_0, window_bounds = array<i64: 1, 16, 16, 32>}, {pipeline_mode = #tpu.pipeline_mode<synchronous>, transform_indices = @transform_1, window_bounds = array<i64: 1, 32>}, {pipeline_mode = #tpu.pipeline_mode<synchronous>, transform_indices = @transform_2, window_bounds = array<i64: 1, 32>}, {pipeline_mode = #tpu.pipeline_mode<synchronous>, transform_indices = @transform_3, window_bounds = array<i64: 32, 32>}, {pipeline_mode = #tpu.pipeline_mode<synchronous>, transform_indices = @transform_4, window_bounds = array<i64: 1, 32>}, {pipeline_mode = #tpu.pipeline_mode<synchronous>, transform_indices = @transform_5, window_bounds = array<i64: 1, 32>}, {pipeline_mode = #tpu.pipeline_mode<synchronous>, transform_indices = @transform_6, window_bounds = array<i64: 288, 32>}, {pipeline_mode = #tpu.pipeline_mode<synchronous>, transform_indices = @transform_7, window_bounds = array<i64: 1, 32>}, {transform_indices = @transform_8, window_bounds = array<i64: 1, 16, 16, 32>}]} {
    %c0 = arith.constant 0 : index
    %c0_0 = arith.constant 0 : index
    %c0_1 = arith.constant 0 : index
    %c0_2 = arith.constant 0 : index
    %0 = vector.load %arg1[%c0, %c0_0, %c0_1, %c0_2] : memref<1x16x16x32xf32, #tpu.memory_space<vmem>>, vector<1x16x16x32xf32>
    %1 = vector.shape_cast %0 : vector<1x16x16x32xf32> to vector<16x16x32xf32>
    %2 = vector.shape_cast %1 : vector<16x16x32xf32> to vector<256x32xf32>
    %c0_3 = arith.constant 0 : index
    %c0_4 = arith.constant 0 : index
    %3 = vector.load %arg2[%c0_3, %c0_4] : memref<1x32xf32, #tpu.memory_space<vmem>>, vector<1x32xf32>
    %4 = vector.broadcast %3 : vector<1x32xf32> to vector<256x32xf32>
    %5 = arith.mulf %2, %4 : vector<256x32xf32>
    %c0_5 = arith.constant 0 : index
    %c0_6 = arith.constant 0 : index
    %6 = vector.load %arg3[%c0_5, %c0_6] : memref<1x32xf32, #tpu.memory_space<vmem>>, vector<1x32xf32>
    %7 = vector.broadcast %6 : vector<1x32xf32> to vector<256x32xf32>
    %8 = arith.addf %5, %7 : vector<256x32xf32>
    %cst = arith.constant 0.000000e+00 : f32
    %9 = vector.broadcast %cst : f32 to vector<256x32xf32>
    %10 = arith.maximumf %8, %9 : vector<256x32xf32>
    %11 = arith.truncf %10 : vector<256x32xf32> to vector<256x32xbf16>
    %c0_7 = arith.constant 0 : index
    %c0_8 = arith.constant 0 : index
    %12 = vector.load %arg4[%c0_7, %c0_8] : memref<32x32xbf16, #tpu.memory_space<vmem>>, vector<32x32xbf16>
    %cst_9 = arith.constant dense<0.000000e+00> : vector<256x32xf32>
    %13 = tpu.matmul %11, %12, %cst_9 {dimension_numbers = #tpu.dot_dimension_numbers<[1], [0], [0], [1], [0, 0, 1, 1], [], []>} : vector<256x32xbf16>, vector<32x32xbf16>, vector<256x32xf32> -> vector<256x32xf32>
    %c0_10 = arith.constant 0 : index
    %c0_11 = arith.constant 0 : index
    %14 = vector.load %arg5[%c0_10, %c0_11] : memref<1x32xf32, #tpu.memory_space<vmem>>, vector<1x32xf32>
    %15 = vector.broadcast %14 : vector<1x32xf32> to vector<256x32xf32>
    %16 = arith.mulf %13, %15 : vector<256x32xf32>
    %c0_12 = arith.constant 0 : index
    %c0_13 = arith.constant 0 : index
    %17 = vector.load %arg6[%c0_12, %c0_13] : memref<1x32xf32, #tpu.memory_space<vmem>>, vector<1x32xf32>
    %18 = vector.broadcast %17 : vector<1x32xf32> to vector<256x32xf32>
    %19 = arith.addf %16, %18 : vector<256x32xf32>
    %cst_14 = arith.constant 0.000000e+00 : f32
    %20 = vector.broadcast %cst_14 : f32 to vector<256x32xf32>
    %21 = arith.maximumf %19, %20 : vector<256x32xf32>
    %22 = tpu.iota {dimensions = array<i32: 1>} : vector<16x16x32xi32>
    %23 = vector.shape_cast %22 : vector<16x16x32xi32> to vector<256x32xi32>
    %cst_15 = arith.constant 0.000000e+00 : f32
    %24 = vector.broadcast %cst_15 : f32 to vector<256x32xf32>
    %c15_i32 = arith.constant 15 : i32
    %25 = vector.broadcast %c15_i32 : i32 to vector<256x32xi32>
    %26 = arith.cmpi slt, %23, %25 : vector<256x32xi32>
    %c255_i32 = arith.constant 255 : i32
    %27 = tpu.dynamic_rotate %21 by %c255_i32 dim 0 : vector<256x32xf32>, i32 -> vector<256x32xf32>
    %28 = arith.select %26, %27, %24 : vector<256x32xi1>, vector<256x32xf32>
    %c1_i32 = arith.constant 1 : i32
    %29 = vector.broadcast %c1_i32 : i32 to vector<256x32xi32>
    %30 = arith.cmpi sge, %23, %29 : vector<256x32xi32>
    %c1_i32_16 = arith.constant 1 : i32
    %31 = tpu.dynamic_rotate %21 by %c1_i32_16 dim 0 : vector<256x32xf32>, i32 -> vector<256x32xf32>
    %32 = arith.select %30, %31, %24 : vector<256x32xi1>, vector<256x32xf32>
    %cst_17 = arith.constant 0.000000e+00 : f32
    %33 = vector.broadcast %cst_17 : f32 to vector<16x32xf32>
    %34 = vector.extract_strided_slice %32 {offsets = [0, 0], sizes = [240, 32], strides = [1, 1]} : vector<256x32xf32> to vector<240x32xf32>
    %35 = tpu.concatenate %33, %34 in 0 : vector<16x32xf32>, vector<240x32xf32> -> vector<256x32xf32>
    %36 = vector.extract_strided_slice %21 {offsets = [0, 0], sizes = [240, 32], strides = [1, 1]} : vector<256x32xf32> to vector<240x32xf32>
    %37 = tpu.concatenate %33, %36 in 0 : vector<16x32xf32>, vector<240x32xf32> -> vector<256x32xf32>
    %38 = vector.extract_strided_slice %28 {offsets = [0, 0], sizes = [240, 32], strides = [1, 1]} : vector<256x32xf32> to vector<240x32xf32>
    %39 = tpu.concatenate %33, %38 in 0 : vector<16x32xf32>, vector<240x32xf32> -> vector<256x32xf32>
    %40 = vector.extract_strided_slice %32 {offsets = [16, 0], sizes = [240, 32], strides = [1, 1]} : vector<256x32xf32> to vector<240x32xf32>
    %41 = tpu.concatenate %40, %33 in 0 : vector<240x32xf32>, vector<16x32xf32> -> vector<256x32xf32>
    %42 = vector.extract_strided_slice %21 {offsets = [16, 0], sizes = [240, 32], strides = [1, 1]} : vector<256x32xf32> to vector<240x32xf32>
    %43 = tpu.concatenate %42, %33 in 0 : vector<240x32xf32>, vector<16x32xf32> -> vector<256x32xf32>
    %44 = vector.extract_strided_slice %28 {offsets = [16, 0], sizes = [240, 32], strides = [1, 1]} : vector<256x32xf32> to vector<240x32xf32>
    %45 = tpu.concatenate %44, %33 in 0 : vector<240x32xf32>, vector<16x32xf32> -> vector<256x32xf32>
    %46 = tpu.concatenate %35, %37, %39, %32, %21, %28, %41, %43, %45 in 1 : vector<256x32xf32>, vector<256x32xf32>, vector<256x32xf32>, vector<256x32xf32>, vector<256x32xf32>, vector<256x32xf32>, vector<256x32xf32>, vector<256x32xf32>, vector<256x32xf32> -> vector<256x288xf32>
    %47 = arith.truncf %46 : vector<256x288xf32> to vector<256x288xbf16>
    %c0_18 = arith.constant 0 : index
    %c0_19 = arith.constant 0 : index
    %48 = vector.load %arg7[%c0_18, %c0_19] : memref<288x32xbf16, #tpu.memory_space<vmem>>, vector<288x32xbf16>
    %cst_20 = arith.constant dense<0.000000e+00> : vector<256x32xf32>
    %49 = tpu.matmul %47, %48, %cst_20 {dimension_numbers = #tpu.dot_dimension_numbers<[1], [0], [0], [1], [0, 0, 1, 1], [], []>} : vector<256x288xbf16>, vector<288x32xbf16>, vector<256x32xf32> -> vector<256x32xf32>
    %c0_21 = arith.constant 0 : index
    %c0_22 = arith.constant 0 : index
    %50 = vector.load %arg8[%c0_21, %c0_22] : memref<1x32xf32, #tpu.memory_space<vmem>>, vector<1x32xf32>
    %51 = vector.broadcast %50 : vector<1x32xf32> to vector<256x32xf32>
    %52 = arith.addf %49, %51 : vector<256x32xf32>
    %53 = arith.addf %52, %2 : vector<256x32xf32>
    %54 = vector.shape_cast %53 : vector<256x32xf32> to vector<16x16x32xf32>
    %c0_23 = arith.constant 0 : index
    %c0_24 = arith.constant 0 : index
    %c0_25 = arith.constant 0 : index
    %c0_26 = arith.constant 0 : index
    %55 = vector.load %arg9[%c0_23, %c0_24, %c0_25, %c0_26] : memref<1x16x16x32xf32, #tpu.memory_space<vmem>>, vector<1x16x16x32xf32>
    %56 = vector.shape_cast %55 : vector<1x16x16x32xf32> to vector<16x16x32xf32>
    %57 = vector.shape_cast %54 : vector<16x16x32xf32> to vector<1x16x16x32xf32>
    tpu.vector_store %arg9[%c0_23, %c0_24, %c0_25, %c0_26], %57 {strides = array<i32>} : memref<1x16x16x32xf32, #tpu.memory_space<vmem>>, vector<1x16x16x32xf32>,
    return
  }
  func.func @transform_0(%arg0: i32) -> (i32, i32, i32, i32) {
    %c0_i32 = arith.constant 0 : i32
    %c0_i32_0 = arith.constant 0 : i32
    %c0_i32_1 = arith.constant 0 : i32
    %c0_i32_2 = arith.constant 0 : i32
    return %arg0, %c0_i32, %c0_i32_0, %c0_i32_1 : i32, i32, i32, i32
  }
  func.func @transform_1(%arg0: i32) -> (i32, i32) {
    %c0_i32 = arith.constant 0 : i32
    %c0_i32_0 = arith.constant 0 : i32
    %c0_i32_1 = arith.constant 0 : i32
    return %c0_i32, %c0_i32_0 : i32, i32
  }
  func.func @transform_2(%arg0: i32) -> (i32, i32) {
    %c0_i32 = arith.constant 0 : i32
    %c0_i32_0 = arith.constant 0 : i32
    %c0_i32_1 = arith.constant 0 : i32
    return %c0_i32, %c0_i32_0 : i32, i32
  }
  func.func @transform_3(%arg0: i32) -> (i32, i32) {
    %c0_i32 = arith.constant 0 : i32
    %c0_i32_0 = arith.constant 0 : i32
    %c0_i32_1 = arith.constant 0 : i32
    return %c0_i32, %c0_i32_0 : i32, i32
  }
  func.func @transform_4(%arg0: i32) -> (i32, i32) {
    %c0_i32 = arith.constant 0 : i32
    %c0_i32_0 = arith.constant 0 : i32
    %c0_i32_1 = arith.constant 0 : i32
    return %c0_i32, %c0_i32_0 : i32, i32
  }
  func.func @transform_5(%arg0: i32) -> (i32, i32) {
    %c0_i32 = arith.constant 0 : i32
    %c0_i32_0 = arith.constant 0 : i32
    %c0_i32_1 = arith.constant 0 : i32
    return %c0_i32, %c0_i32_0 : i32, i32
  }
  func.func @transform_6(%arg0: i32) -> (i32, i32) {
    %c0_i32 = arith.constant 0 : i32
    %c0_i32_0 = arith.constant 0 : i32
    %c0_i32_1 = arith.constant 0 : i32
    return %c0_i32, %c0_i32_0 : i32, i32
  }
  func.func @transform_7(%arg0: i32) -> (i32, i32) {
    %c0_i32 = arith.constant 0 : i32
    %c0_i32_0 = arith.constant 0 : i32
    %c0_i32_1 = arith.constant 0 : i32
    return %c0_i32, %c0_i32_0 : i32, i32
  }
  func.func @transform_8(%arg0: i32) -> (i32, i32, i32, i32) {
    %c0_i32 = arith.constant 0 : i32
    %c0_i32_0 = arith.constant 0 : i32
    %c0_i32_1 = arith.constant 0 : i32
    %c0_i32_2 = arith.constant 0 : i32
    return %arg0, %c0_i32, %c0_i32_0, %c0_i32_1 : i32, i32, i32, i32
  }
}

</mosaic_0001>

<bundles_post_ra>
// kernel: tpu_custom_call.1
= control target key start
LH: loop header
LB: loop body
LE: loop exit
PB: predicated region body
PF: predicated region fallthrough
CT: control target
= control target key end

     0   :  { %13 = vsyncpa [#allocation3], 0  ;;  %s5491_s0 = inlined_call_operand.hbm [shape: f32[2,16,16,32], index: 0, kind: input, shape index: {}]   ;;  %s5492_s1 = inlined_call_operand.vmem [shape: f32[1,32], index: 1, kind: input, shape index: {}]   ;;  %s5493_s2 = inlined_call_operand.vmem [shape: f32[1,32], index: 2, kind: input, shape index: {}]   ;;  %s5494_s3 = inlined_call_operand.vmem [shape: bf16[32,32], index: 3, kind: input, shape index: {}]   ;;  %s5495_s4 = inlined_call_operand.vmem [shape: f32[1,32], index: 4, kind: input, shape index: {}]   ;;  %s5496_s5 = inlined_call_operand.vmem [shape: f32[1,32], index: 5, kind: input, shape index: {}]   ;;  %s5497_s6 = inlined_call_operand.vmem [shape: bf16[288,32], index: 6, kind: input, shape index: {}]   ;;  %s5498_s7 = inlined_call_operand.vmem [shape: f32[1,32], index: 7, kind: input, shape index: {}]   ;;  %s5499_s8 = inlined_call_operand.hbm [shape: f32[2,16,16,32], index: 8, kind: output, shape index: {}]  }
   0x1   :  { %15 = vsyncpa [#allocation3 + $0x1], 0 }
   0x2   :  { %16 = vsyncpa [#allocation4], 0 }
   0x3   :  { %18 = vsyncpa [#allocation4 + $0x1], 0  ;;  %s3619_s27 = smov 0   ;;  %s3621_s28 = smov 0  }
   0x4   :  { %s3623_s29 = smov 0   ;;  %s3625_s30 = smov 0  }
   0x5 LB: > { %s3640_s9 = sadd.s32 4294967295, %s3561_s30   ;;  %s2590_s10 = sadd.s32 4294967294, %s3561_s30   ;;  %s3561_s30 = sphi %s3625_s30, %s5714_s30   ;;  %s3557_s29 = sphi %s3623_s29, %s5713_s29   ;;  %s3553_s28 = sphi %s3621_s28, %s5712_s28   ;;  %s3549_s27 = sphi %s3619_s27, %s5711_s27  }
   0x6   : > { %s3644_s11 = sadd.s32 1, %s3561_s30   ;;  %s31_s12 = sadd.s32 1, %s3557_s29 }
   0x7   : > { %s28_s13 = ssub.s32 %s3561_s30, %s3644_s11  ;;  %p38_p0 = scmp.ne.s32.totalorder %s3557_s29, %s3553_s28 }
   0x8   : > { %p29_p1 = scmp.eq.s32.totalorder %s28_s13, 0  ;;  %p39_p2 = scmp.eq.s32.totalorder %s3561_s30, 0 }
   0x9   : > { %p44_p3 = scmp.ne.s32.totalorder %s3553_s28, %s3549_s27  ;;  %p45_p4 = scmp.eq.s32.totalorder %s3640_s9, 0 }
   0xa   : > { %s3656_s14 = scalar_select %p29_p1, %s3557_s29, %s31_s12  }
   0xb   : > { %p3658_p5 = por %p39_p2, %p38_p0  ;;  %p3662_p6 = por %p45_p4, %p44_p3 }
   0xc   : > { %p215_p7 = scmp.eq.s32.totalorder %s3640_s9, 1  ;;  %p221_p8 = scmp.eq.s32.totalorder %s2590_s10, 1 }
   0xd   : > { %p2910_p10 = scmp.lt.s32.totalorder %s3561_s30, 2  ;;  %s262_s19 = sand.u32 1, %s3557_s29  }
   0xe   : > { %p3669_p11 = por %p215_p7, %p38_p0  ;;  %p3673_p12 = por %p221_p8, %p44_p3 }
   0xf   : > { %s2660_s20 = sshll.u32 %s3561_s30, 12  ;;  %s2593_s21 = sshll.u32 %s262_s19, 8 }
  0x10   : > { %s5567_s17 = scalar_select %p3669_p11, 1, 0 }
  0x11   : > { %s5568_s18 = scalar_select %p3673_p12, 1, 0 }
  0x12   : > { %s3682_s24 = scalar_lea.hbm %s5491_s0, %s2660_s20  ;;  %s266_s25 = scalar_lea.vmem [#allocation2], %s2593_s21 }
  0x13   : > { %s273_s26 = sshll.u32 %s266_s25, 4  ;;  %p3686_p13 = pnand %p2910_p10, %p3658_p5  ;;  %s3690_s26 = int_to_ptr.vmem [resolvable:$true] %s273_s26 }
  0x14   : > { %s3692_s12 = scalar_lea.sflag [#allocation3], %s262_s19  ;;  %s3465_s13 = scalar_lea.hbm %s3682_s24, 4096 }
  0x15   : > { %p3466_p0 = scmp.ne.s32.totalorder %s3682_s24, %s3465_s13  ;;  %p3467_p1 = pneg %p3686_p13 }
  0x16   : > { %s3470_s21 = scalar_lea.hbm %s5491_s0, 8192  ;;  %p3471_p4 = scmp.lt.u32.totalorder %s3682_s24, %s5491_s0 }
  0x17   : > { %p3468_p2 = pnand %p3467_p1, %p3466_p0  ;;  %p3472_p5 = scmp.lt.u32.totalorder %s3470_s21, %s3465_s13 }
  0x18   : > { %p3474_p8 = scmp.lt.u32.totalorder %s3465_s13, %s3682_s24 }
  0x19   : > { %p3469_p3 = pneg %p3468_p2  ;;  %p3473_p7 = por %p3472_p5, %p3471_p4 }
  0x1b   : > { %p3475_p10 = por %p3474_p8, %p3473_p7 }
  0x1d   : > { %p3476_p9 = pnand %p3475_p10, %p3469_p3 }
  0x1f   : > { %3479 = shalt.err (!%p3476_p9)
}
  0x20   : > { %s3480_s19 = scalar_lea.vmem %s3690_s26, 4096  ;;  %s3563_s25 = smov [#allocation2]  }
  0x21   : > { %p3481_p0 = scmp.ne.s32.totalorder %s3690_s26, %s3480_s19  ;;  %s3485_s20 = sshll.u32 %s3563_s25, 4  ;;  %s3486_s20 = int_to_ptr.vmem [resolvable:$false] %s3485_s20 }
  0x22   : > { %s3487_s15 = scalar_lea.vmem %s3486_s20, 8192  ;;  %p3488_p11 = scmp.lt.s32.totalorder %s3690_s26, %s3486_s20 }
  0x23   : > { %p3483_p2 = pnand %p3481_p0, %p3467_p1  ;;  %p3489_p4 = scmp.lt.s32.totalorder %s3487_s15, %s3480_s19 }
  0x25   : > { %p3484_p12 = pneg %p3483_p2  ;;  %p3490_p5 = por %p3489_p4, %p3488_p11 }
  0x27   : > { %p3491_p7 = pnand %p3490_p5, %p3484_p12 }
  0x29   : > { %3494 = shalt.err (!%p3491_p7)
}
  0x2a   : > { %s3564_s13 = smov 128   ;;  %s3565_s21 = smov 8  }
  0x2b   : > { %2905 = dma.hbm_to_vmem [thread:$0]  (!%p3686_p13), %s3682_s24, 4096, %s3690_s26, %s3692_s12, %s3564_s13, %s3564_s13, %s3565_s21  }
  0x2c   : > { %p2596_p9 = scmp.ge.s32.totalorder %s3561_s30, 1  ;;  %p281_p1 = scmp.lt.s32.totalorder %s3561_s30, 3 }
  0x2e   : > { %p282_p3 = pnand %p2596_p9, %p281_p1 }
  0x30   : > { %285 = sbr.rel (%p282_p3) target bundleno = 838 (0x346), region = 52 }
  0x37   : > { %s3723_s22 = sand.u32 1, %s3553_s28  }
  0x38   : > { %s2597_s23 = sshll.u32 %s3723_s22, 8  ;;  %s288_s19 = scalar_lea.sflag [#allocation3], %s3723_s22 }
  0x39   : > { %s3729_s25 = scalar_lea.vmem [#allocation2], %s2597_s23 }
  0x3a   : > { %3540 = dma.done.wait (%p3662_p6), %s288_s19, 4096  }
  0x3b   : > { %3542 = vsyncadd (%p3662_p6), %s288_s19, 4294963200  ;;  %v3413_v0 = vld [vmem:[%s5494_s3] sm:$0xff]   ;;  %v3414_v1 = vld [vmem:[%s5494_s3 + $0x8] sm:$0xff]   ;;  %vm499_vm0 = vcmask 261120   ;;  %s3566_s16 = smov 96   ;;  %s3567_s20 = smov 32  }
  0x3c   : > { %2810 = vmatprep.subr.bf16.mxu0 %v3413_v0  ;;  %v325_v2 = vld [vmem:[%s3729_s25] sm:$0xff]  ;;  %v326_v3 = vld [vmem:[%s3729_s25 + $0x8] sm:$0xff]  ;;  %v327_v8 = vld [vmem:[%s3729_s25 + $0x10] sm:$0xff]  ;;  %s3568_s10 = smov 64   ;;  %vm1709_vm5 = vcmask 523264   ;;  %vm1741_vm6 = vcmask 785408  }
  0x3d   : > { %v3746_v4 = vld [vmem:[%s5492_s1] ss:$0 sm:$0xff]  ;;  %2811 = vmatpush3.bf16.msra.mxu0 %v3413_v0  ;;  %v328_v9 = vld [vmem:[%s3729_s25 + $0x18] sm:$0xff]  ;;  %v330_v13 = vld [vmem:[%s3729_s25 + $0x28] sm:$0xff]  ;;  %s5284_s21 = scalar_lea.vmem [#allocation5], %s2597_s23  ;;  %s2661_s23 = sshll.u32 %s3640_s9, 12 }
  0x3e   : > { %v364_v5 = vmul.f32 %v3746_v4, %v325_v2  ;;  %v365_v6 = vmul.f32 %v3746_v4, %v326_v3  ;;  %v3753_v7 = vld [vmem:[%s5493_s2] ss:$0 sm:$0xff]  ;;  %2812 = vmatprep.subr.bf16.mxu0 %v3414_v1  ;;  %v366_v10 = vmul.f32 %v3746_v4, %v327_v8  ;;  %v367_v11 = vmul.f32 %v3746_v4, %v328_v9  ;;  %v331_v14 = vld [vmem:[%s3729_s25 + $0x30] sm:$0xff]  ;;  %v332_v19 = vld [vmem:[%s3729_s25 + $0x38] sm:$0xff]  ;;  %s2517_s19 = sshll.u32 %s5284_s21, 4  ;;  %s5438_s12 = scalar_lea.hbm %s5499_s8, %s2661_s23  ;;  %s5440_s19 = int_to_ptr.vmem [resolvable:$true] %s2517_s19 }
  0x3f   : > { %v329_v12 = vld [vmem:[%s3729_s25 + $0x20] sm:$0xff]  ;;  %v369_v18 = vmul.f32 %v3746_v4, %v330_v13  ;;  %v370_v22 = vmul.f32 %v3746_v4, %v331_v14  ;;  %v371_v23 = vmul.f32 %v3746_v4, %v332_v19  ;;  %v334_v29 = vld [vmem:[%s3729_s25 + $0x48] sm:$0xff]  ;;  %v335_v34 = vld [vmem:[%s3729_s25 + $0x50] sm:$0xff]  ;;  %s2504_s9 = scalar_lea.sflag [#allocation4], %s3723_s22  ;;  %s3495_s15 = scalar_lea.vmem %s5440_s19, 4096 }
  0x40   : > { %v403_v15 = vadd.f32 %v3753_v7, %v364_v5  ;;  %v404_v16 = vadd.f32 %v3753_v7, %v365_v6  ;;  %v368_v17 = vmul.f32 %v3746_v4, %v329_v12  ;;  %v405_v20 = vadd.f32 %v3753_v7, %v366_v10  ;;  %v333_v24 = vld [vmem:[%s3729_s25 + $0x40] sm:$0xff]  ;;  %v336_v35 = vld [vmem:[%s3729_s25 + $0x58] sm:$0xff]  ;;  %v338_v43 = vld [vmem:[%s3729_s25 + $0x68] sm:$0xff]  ;;  %p3496_p6 = scmp.ne.s32.totalorder %s5440_s19, %s3495_s15  ;;  %p5708_p11 = scmp.ne.s32.totalorder %s5567_s17, 0 }
  0x41   : > { %v406_v21 = vadd.f32 %v3753_v7, %v367_v11  ;;  %2813 = vmatpush3.bf16.msra.mxu0 %v3414_v1  ;;  %v408_v28 = vadd.f32 %v3753_v7, %v369_v18  ;;  %v409_v32 = vadd.f32 %v3753_v7, %v370_v22  ;;  %v410_v33 = vadd.f32 %v3753_v7, %v371_v23  ;;  %v337_v42 = vld [vmem:[%s3729_s25 + $0x60] sm:$0xff]  ;;  %v339_v57 = vld [vmem:[%s3729_s25 + $0x70] sm:$0xff]  ;;  %v340_v59 = vld [vmem:[%s3729_s25 + $0x78] sm:$0xff] }
  0x42   : > { %v435_v25 = vmax.f32 %v403_v15, 0.0  ;;  %v436_v26 = vmax.f32 %v404_v16, 0.0  ;;  %v407_v27 = vadd.f32 %v3753_v7, %v368_v17  ;;  %v437_v30 = vmax.f32 %v405_v20, 0.0  ;;  %v341_v63 = vld [vmem:[%s3729_s25 + $0x80] sm:$0xff]  ;;  %v342_v0 = vld [vmem:[%s3729_s25 + $0x88] sm:$0xff]  ;;  %v343_v11 = vld [vmem:[%s3729_s25 + $0x90] sm:$0xff]  ;;  %p3497_p12 = pnand %p3496_p6, %p5708_p11 }
  0x43   : > { %v438_v31 = vmax.f32 %v406_v21, 0.0  ;;  %v440_v38 = vmax.f32 %v408_v28, 0.0  ;;  %v372_v39 = vmul.f32 %v3746_v4, %v333_v24  ;;  %v373_v41 = vmul.f32 %v3746_v4, %v334_v29  ;;  %v344_v15 = vld [vmem:[%s3729_s25 + $0x98] sm:$0xff]  ;;  %v345_v19 = vld [vmem:[%s3729_s25 + $0xa0] sm:$0xff]  ;;  %v346_v20 = vld [vmem:[%s3729_s25 + $0xa8] sm:$0xff] }
  0x44   : > { %v467_v36 = vpack.c.bf16 %v436_v26, %v435_v25  ;;  %v439_v37 = vmax.f32 %v407_v27, 0.0  ;;  %v374_v46 = vmul.f32 %v3746_v4, %v335_v34  ;;  %v375_v47 = vmul.f32 %v3746_v4, %v336_v35  ;;  %v347_v35 = vld [vmem:[%s3729_s25 + $0xb0] sm:$0xff]  ;;  %p3498_p13 = pneg %p3497_p12 }
  0x45   : > { %v468_v40 = vpack.c.bf16 %v438_v31, %v437_v30  ;;  %v411_v45 = vadd.f32 %v3753_v7, %v372_v39  ;;  %v441_v48 = vmax.f32 %v409_v32, 0.0  ;;  %v442_v49 = vmax.f32 %v410_v33, 0.0 }
  0x46   : > { %2814 = vmatprep.mubr.msk.bf16.mxu0 %vm499_vm0, %v467_v36  ;;  %v469_v44 = vpack.c.bf16 %v440_v38, %v439_v37  ;;  %v412_v50 = vadd.f32 %v3753_v7, %v373_v41  ;;  %v376_v52 = vmul.f32 %v3746_v4, %v337_v42  ;;  %v377_v53 = vmul.f32 %v3746_v4, %v338_v43  ;;  %v348_v36 = vld [vmem:[%s3729_s25 + $0xb8] sm:$0xff]  ;;  %v349_v37 = vld [vmem:[%s3729_s25 + $0xc0] sm:$0xff]  ;;  %v350_v38 = vld [vmem:[%s3729_s25 + $0xc8] sm:$0xff] }
  0x47   : > { %2815 = vmatmul.mubr.msk.bf16.vlgmr.msra.gmra.mrb[0].mxu0 %vm499_vm0, %v468_v40  ;;  %v443_v51 = vmax.f32 %v411_v45, 0.0  ;;  %v413_v55 = vadd.f32 %v3753_v7, %v374_v46  ;;  %v414_v56 = vadd.f32 %v3753_v7, %v375_v47  ;;  %v470_v58 = vpack.c.bf16 %v442_v49, %v441_v48 }
  0x48   : > { %2818 = vmatprep.mubr.msk.bf16.mxu0 %vm499_vm0, %v469_v44  ;;  %v444_v54 = vmax.f32 %v412_v50, 0.0  ;;  %v415_v61 = vadd.f32 %v3753_v7, %v376_v52  ;;  %v416_v62 = vadd.f32 %v3753_v7, %v377_v53  ;;  %v378_v3 = vmul.f32 %v3746_v4, %v339_v57  ;;  %v351_v53 = vld [vmem:[%s3729_s25 + $0xd0] sm:$0xff] }
  0x49   : > { %v445_v1 = vmax.f32 %v413_v55, 0.0  ;;  %v446_v2 = vmax.f32 %v414_v56, 0.0  ;;  %v379_v5 = vmul.f32 %v3746_v4, %v340_v59  ;;  %v380_v9 = vmul.f32 %v3746_v4, %v341_v63  ;;  %v353_v55 = vld [vmem:[%s3729_s25 + $0xe0] sm:$0xff]  ;;  %v354_v56 = vld [vmem:[%s3729_s25 + $0xe8] sm:$0xff] }
  0x4a   : > { %v471_v60 = vpack.c.bf16 %v444_v54, %v443_v51  ;;  %v447_v6 = vmax.f32 %v415_v61, 0.0  ;;  %v448_v8 = vmax.f32 %v416_v62, 0.0  ;;  %v381_v10 = vmul.f32 %v3746_v4, %v342_v0  ;;  %v352_v54 = vld [vmem:[%s3729_s25 + $0xd8] sm:$0xff] }
  0x4b   : > { %v472_v12 = vpack.c.bf16 %v446_v2, %v445_v1  ;;  %v417_v13 = vadd.f32 %v3753_v7, %v378_v3  ;;  %v418_v14 = vadd.f32 %v3753_v7, %v379_v5  ;;  %v419_v17 = vadd.f32 %v3753_v7, %v380_v9  ;;  %v355_v9 = vld [vmem:[%s3729_s25 + $0xf0] sm:$0xff] }
  0x4c   : > { %v473_v16 = vpack.c.bf16 %v448_v8, %v447_v6  ;;  %v420_v18 = vadd.f32 %v3753_v7, %v381_v10  ;;  %v382_v23 = vmul.f32 %v3746_v4, %v343_v11  ;;  %v383_v24 = vmul.f32 %v3746_v4, %v344_v15  ;;  %v356_v10 = vld [vmem:[%s3729_s25 + $0xf8] sm:$0xff] }
  0x4d   : > { %v449_v21 = vmax.f32 %v417_v13, 0.0  ;;  %v450_v22 = vmax.f32 %v418_v14, 0.0  ;;  %v451_v25 = vmax.f32 %v419_v17, 0.0  ;;  %v384_v27 = vmul.f32 %v3746_v4, %v345_v19 }
  0x4e   : > { %v452_v26 = vmax.f32 %v420_v18, 0.0  ;;  %v385_v28 = vmul.f32 %v3746_v4, %v346_v20  ;;  %v421_v30 = vadd.f32 %v3753_v7, %v382_v23  ;;  %v422_v31 = vadd.f32 %v3753_v7, %v383_v24  ;;  %v3866_v24 = vld [vmem:[%s5495_s4] ss:$0 sm:$0xff] }
  0x4f   : > { %2819 = vmatmul.mubr.msk.bf16.gmra.mrb[4].mxu0 %vm499_vm0, %v470_v58  ;;  %v474_v29 = vpack.c.bf16 %v450_v22, %v449_v21  ;;  %v423_v33 = vadd.f32 %v3753_v7, %v384_v27  ;;  %v386_v41 = vmul.f32 %v3746_v4, %v347_v35  ;;  %v387_v42 = vmul.f32 %v3746_v4, %v348_v36  ;;  %v3415_v27 = vld [vmem:[%s5497_s6 + $0x40] sm:$0xff]  }
  0x50   : > { %2822 = vmatprep.mubr.msk.bf16.mxu0 %vm499_vm0, %v471_v60  ;;  %v475_v32 = vpack.c.bf16 %v452_v26, %v451_v25  ;;  %v424_v34 = vadd.f32 %v3753_v7, %v385_v28  ;;  %v453_v39 = vmax.f32 %v421_v30, 0.0  ;;  %v454_v40 = vmax.f32 %v422_v31, 0.0  ;;  %v3416_v28 = vld [vmem:[%s5497_s6] sm:$0xff]   ;;  %2882 = vmatprep.subr.bf16.mxu1 %v3415_v27 }
  0x51   : > { %v455_v43 = vmax.f32 %v423_v33, 0.0  ;;  %v388_v45 = vmul.f32 %v3746_v4, %v349_v37  ;;  %v389_v46 = vmul.f32 %v3746_v4, %v350_v38  ;;  %v425_v48 = vadd.f32 %v3753_v7, %v386_v41  ;;  %v3417_v33 = vld [vmem:[%s5497_s6 + $0x48] sm:$0xff]   ;;  %2680 = vmatprep.subr.bf16.mxu0 %v3415_v27  ;;  %2890 = vmatpush3.bf16.msra.mxu1 %v3416_v28 }
  0x52   : > { %v456_v44 = vmax.f32 %v424_v34, 0.0  ;;  %v476_v47 = vpack.c.bf16 %v454_v40, %v453_v39  ;;  %v426_v49 = vadd.f32 %v3753_v7, %v387_v42  ;;  %v390_v59 = vmul.f32 %v3746_v4, %v351_v53  ;;  %v3418_v37 = vld [vmem:[%s5497_s6 + $0x8] sm:$0xff]   ;;  %2681 = vmatpush3.bf16.msra.mxu0 %v3416_v28  ;;  %2883 = vmatprep.subr.bf16.mxu1 %v3417_v33 }
  0x53   : > { %v427_v51 = vadd.f32 %v3753_v7, %v388_v45  ;;  %v428_v52 = vadd.f32 %v3753_v7, %v389_v46  ;;  %v457_v57 = vmax.f32 %v425_v48, 0.0  ;;  %v391_v60 = vmul.f32 %v3746_v4, %v352_v54  ;;  %2682 = vmatprep.subr.bf16.mxu0 %v3417_v33  ;;  %v3419_v48 = vld [vmem:[%s5497_s6 + $0x50] sm:$0xff]  }
  0x54   : > { %v477_v50 = vpack.c.bf16 %v456_v44, %v455_v43  ;;  %v458_v58 = vmax.f32 %v426_v49, 0.0  ;;  %v392_v63 = vmul.f32 %v3746_v4, %v353_v55  ;;  %v393_v0 = vmul.f32 %v3746_v4, %v354_v56  ;;  %v3420_v49 = vld [vmem:[%s5497_s6 + $0x10] sm:$0xff]  }
  0x55   : > { %v459_v61 = vmax.f32 %v427_v51, 0.0  ;;  %v460_v62 = vmax.f32 %v428_v52, 0.0  ;;  %v429_v2 = vadd.f32 %v3753_v7, %v390_v59  ;;  %v430_v3 = vadd.f32 %v3753_v7, %v391_v60  ;;  %2891 = vmatpush3.bf16.msra.mxu1 %v3418_v37 }
  0x56   : > { %v478_v1 = vpack.c.bf16 %v458_v58, %v457_v57  ;;  %v431_v6 = vadd.f32 %v3753_v7, %v392_v63  ;;  %v432_v8 = vadd.f32 %v3753_v7, %v393_v0  ;;  %v394_v13 = vmul.f32 %v3746_v4, %v355_v9  ;;  %2683 = vmatpush3.bf16.msra.mxu0 %v3418_v37 }
  0x57   : > { %2823 = vmatmul.mubr.msk.bf16.gmra.mrb[8].mxu0 %vm499_vm0, %v472_v12  ;;  %v479_v5 = vpack.c.bf16 %v460_v62, %v459_v61  ;;  %v461_v11 = vmax.f32 %v429_v2, 0.0  ;;  %v462_v12 = vmax.f32 %v430_v3, 0.0  ;;  %v395_v14 = vmul.f32 %v3746_v4, %v356_v10  ;;  %2884 = vmatprep.subr.bf16.mxu1 %v3419_v48 }
  0x58   : > { %2826 = vmatprep.mubr.msk.bf16.mxu0 %vm499_vm0, %v473_v16  ;;  %v463_v15 = vmax.f32 %v431_v6, 0.0  ;;  %v464_v16 = vmax.f32 %v432_v8, 0.0  ;;  %v433_v18 = vadd.f32 %v3753_v7, %v394_v13  ;;  %v819_v4 = vlaneseq  ;;  %2684 = vmatprep.subr.bf16.mxu0 %v3419_v48  ;;  %v3423_v13 = vld [vmem:[%s5497_s6 + $0x60] sm:$0xff]   ;;  %v3428_v48 = vld [vmem:[%s5497_s6 + $0x30] sm:$0xff]  }
  0x59   : > { %v480_v17 = vpack.c.bf16 %v462_v12, %v461_v11  ;;  %v434_v19 = vadd.f32 %v3753_v7, %v395_v14  ;;  %v3871_v7 = vld [vmem:[%s5496_s5] ss:$0 sm:$0xff]  ;;  %2892 = vmatpush3.bf16.msra.mxu1 %v3420_v49  ;;  %v3422_v11 = vld [vmem:[%s5497_s6 + $0x18] sm:$0xff]  }
  0x5a   : > { %v481_v20 = vpack.c.bf16 %v464_v16, %v463_v15  ;;  %v465_v21 = vmax.f32 %v433_v18, 0.0  ;;  %v3873_v26 = vshrl.u32 %v819_v4, 7  ;;  %2685 = vmatpush3.bf16.msra.mxu0 %v3420_v49 }
  0x5b   : > { %v466_v22 = vmax.f32 %v434_v19, 0.0 }
  0x5c   : > { %v3894_v40 = vadd.s32 8, %v3873_v26  ;;  %vm856_vm1 = vcmp.lt.s32.totalorder %v3873_v26, 7  ;;  %vm955_vm2 = vcmp.lt.s32.totalorder %v3873_v26, 1  ;;  %vm921_vm4 = vcmp.ge.s32.totalorder %v3873_v26, 1 }
  0x5d   : > { %v482_v23 = vpack.c.bf16 %v466_v22, %v465_v21  ;;  %v3424_v22 = vld [vmem:[%s5497_s6 + $0x20] sm:$0xff]  }
  0x5e   : > { %vm823_vm3 = vcmp.lt.s32.totalorder %v3894_v40, 15 }
  0x5f   : > { %2827 = vmatmul.mubr.msk.bf16.gmra.mrb[12].mxu0 %vm499_vm0, %v474_v29 }
  0x60   : > { %2830 = vmatprep.mubr.msk.bf16.mxu0 %vm499_vm0, %v475_v32 }
  0x67   : > { %2831 = vmatmul.mubr.msk.bf16.gmra.mrb[16].mxu0 %vm499_vm0, %v476_v47 }
  0x68   : > { %2834 = vmatprep.mubr.msk.bf16.mxu0 %vm499_vm0, %v477_v50 }
  0x6f   : > { %2835 = vmatmul.mubr.msk.bf16.gmra.mrb[20].mxu0 %vm499_vm0, %v478_v1 }
  0x70   : > { %2838 = vmatprep.mubr.msk.bf16.mxu0 %vm499_vm0, %v479_v5  ;;  %v3421_v5 = vld [vmem:[%s5497_s6 + $0x58] sm:$0xff]  }
  0x71   : > { %2885 = vmatprep.subr.bf16.mxu1 %v3421_v5  ;;  %2686 = vmatprep.subr.bf16.mxu0 %v3421_v5 }
  0x72   : > { %2893 = vmatpush3.bf16.msra.mxu1 %v3422_v11  ;;  %2687 = vmatpush3.bf16.msra.mxu0 %v3422_v11 }
  0x73   : > { %2886 = vmatprep.subr.bf16.mxu1 %v3423_v13  ;;  %2688 = vmatprep.subr.bf16.mxu0 %v3423_v13 }
  0x76   : > { %2894 = vmatpush3.bf16.msra.mxu1 %v3424_v22  ;;  %2689 = vmatpush3.bf16.msra.mxu0 %v3424_v22 }
  0x77   : > { %2839 = vmatmul.mubr.msk.bf16.gmra.mrb[24].mxu0 %vm499_vm0, %v480_v17 }
  0x78   : > { %2842 = vmatprep.mubr.msk.bf16.mxu0 %vm499_vm0, %v481_v20 }
  0x7f   : > { %2843 = vmatmul.mubr.msk.bf16.gmra.mrb[28].mxu0 %vm499_vm0, %v482_v23 }
 0x11a   : > { %v2816_v25 = vpop.f32.mrb[0].mxu0 }
 0x11b   : > { %v718_v29 = vmul.f32 %v2816_v25, %v3866_v24  ;;  %v582_v30 = vpop.f32.mrb[1].mxu0  ;;  %v3425_v25 = vld [vmem:[%s5497_s6 + $0x68] sm:$0xff]  }
 0x11c   : > { %v716_v31 = vmul.f32 %v3866_v24, %v582_v30  ;;  %v2817_v32 = vpop.f32.mrb[2].mxu0  ;;  %2887 = vmatprep.subr.bf16.mxu1 %v3425_v25  ;;  %2690 = vmatprep.subr.bf16.mxu0 %v3425_v25 }
 0x11d   : > { %v757_v34 = vadd.f32 %v3871_v7, %v718_v29  ;;  %v719_v35 = vmul.f32 %v2817_v32, %v3866_v24  ;;  %v585_v36 = vpop.f32.mrb[3].mxu0  ;;  %v3426_v32 = vld [vmem:[%s5497_s6 + $0x28] sm:$0xff]  }
 0x11e   : > { %v755_v38 = vadd.f32 %v3871_v7, %v716_v31  ;;  %v717_v39 = vmul.f32 %v3866_v24, %v585_v36  ;;  %2895 = vmatpush3.bf16.msra.mxu1 %v3426_v32  ;;  %2691 = vmatpush3.bf16.msra.mxu0 %v3426_v32 }
 0x11f   : > { %v3896_v41 = vmax.f32 %v757_v34, 0.0  ;;  %v758_v42 = vadd.f32 %v3871_v7, %v719_v35  ;;  %v3427_v35 = vld [vmem:[%s5497_s6 + $0x70] sm:$0xff]  }
 0x120   : > { %v3899_v43 = vmax.f32 %v755_v38, 0.0  ;;  %v756_v44 = vadd.f32 %v3871_v7, %v717_v39  ;;  %2888 = vmatprep.subr.bf16.mxu1 %v3427_v35  ;;  %2692 = vmatprep.subr.bf16.mxu0 %v3427_v35 }
 0x121   : > { %v3902_v45 = vmax.f32 %v758_v42, 0.0  ;;  %v826_v53 = vrot.slane %v3896_v41, 1  ;;  %v925_v62 = vrot.slane %v3896_v41, 7 }
 0x122   : > { %v3906_v46 = vmax.f32 %v756_v44, 0.0  ;;  %v2820_v47 = vpop.f32.mrb[4].mxu0  ;;  %v5502_v57 = vrot.slane %v3899_v43, 1  ;;  %2896 = vmatpush3.bf16.msra.mxu1 %v3428_v48  ;;  %2693 = vmatpush3.bf16.msra.mxu0 %v3428_v48 }
 0x123   : > { %v722_v50 = vmul.f32 %v2820_v47, %v3866_v24  ;;  %v598_v51 = vpop.f32.mrb[5].mxu0  ;;  %v2958_v52 = vpack.i.bf16 %v3902_v45, %v3896_v41  ;;  %v926_v63 = vrot.slane %v3902_v45, 7  ;;  %v827_v33 = vrot.slane %v3902_v45, 1 }
 0x124   : > { %v5501_v54 = vrot.slane %v3906_v46, 7  ;;  %v720_v55 = vmul.f32 %v3866_v24, %v598_v51  ;;  %v2821_v56 = vpop.f32.mrb[6].mxu0  ;;  %v825_v58 = vrot.slane %v3906_v46, 1  ;;  %v2963_v8 = vpack.i.bf16 %v3906_v46, %v3899_v43 }
 0x125   : > { %v761_v59 = vadd.f32 %v3871_v7, %v722_v50  ;;  %v723_v60 = vmul.f32 %v2821_v56, %v3866_v24  ;;  %2959 = vrot.lane.b32.xlu0 %v2958_v52, %s3566_s16  ;;  %2954 = vrot.lane.b32.xlu1 %v2958_v52, %s3567_s20  ;;  %v601_v61 = vpop.f32.mrb[7].mxu0  ;;  %v3977_v21 = vsel %vm955_vm2, %v925_v62, %v926_v63 }
 0x126   : > { %v759_v0 = vadd.f32 %v3871_v7, %v720_v55  ;;  %v721_v1 = vmul.f32 %v3866_v24, %v601_v61  ;;  %v886_v2 = vsel %vm856_vm1, %v825_v58, %v826_v53  ;;  %v887_v3 = vsel %vm856_vm1, %v5502_v57, %v825_v58 }
 0x127   : > { %v762_v6 = vadd.f32 %v3871_v7, %v723_v60  ;;  %v890_v9 = vsel %vm823_vm3, %v886_v2, 0.0  ;;  %v985_v10 = vsel %vm955_vm2, %v5501_v54, %v925_v62  ;;  %v3963_v15 = vmax.f32 %v761_v59, 0.0  ;;  %v3429_v62 = vld [vmem:[%s5497_s6 + $0x78] sm:$0xff]  }
 0x128   : > { %v2968_v12 = vpack.i.bf16 %v890_v9, %v887_v3  ;;  %v3961_v14 = vsel %vm921_vm4, %v985_v10, 0.0  ;;  %v3965_v16 = vmax.f32 %v759_v0, 0.0  ;;  %v760_v18 = vadd.f32 %v3871_v7, %v721_v1  ;;  %v3430_v1 = vld [vmem:[%s5497_s6 + $0x38] sm:$0xff]   ;;  %2889 = vmatprep.subr.bf16.mxu1 %v3429_v62  ;;  %2694 = vmatprep.subr.bf16.mxu0 %v3429_v62 }
 0x129   : > { %2964 = vrot.lane.b32.xlu0 %v2963_v8, %s3567_s20  ;;  %5570 = vst [vmem:[#allocation8_spill] sm:$0xff] %v3963_v15  ;;  %v3967_v17 = vmax.f32 %v762_v6, 0.0  ;;  %v2973_v4 = vpack.i.bf16 %v3977_v21, %v3961_v14  ;;  %v830_v31 = vrot.slane %v3963_v15, 1  ;;  %v4056_v0 = vsel %vm856_vm1, %v826_v53, %v827_v33  ;;  %2897 = vmatpush3.bf16.msra.mxu1 %v3430_v1 }
 0x12a   : > { %2969 = vrot.lane.b32.xlu1 %v2968_v12, %s3568_s10  ;;  %v3971_v19 = vpop.f32.mrb[8].mxu0  ;;  %v3990_v28 = vmax.f32 %v760_v18, 0.0  ;;  %v828_v30 = vrot.slane %v3965_v16, 1  ;;  %v927_v38 = vrot.slane %v3965_v16, 7  ;;  %5575 = vst [vmem:[#allocation13_spill] sm:$0xff] %v4056_v0  ;;  %v929_v6 = vrot.slane %v3963_v15, 7  ;;  %2695 = vmatpush3.bf16.msra.mxu0 %v3430_v1 }
 0x12b   : > { %5571 = vst [vmem:[#allocation9_spill] sm:$0xff] %v3967_v17  ;;  %v614_v20 = vpop.f32.mrb[9].mxu0  ;;  %v2993_v29 = vpack.i.bf16 %v3967_v17, %v3963_v15  ;;  %v726_v8 = vmul.f32 %v3971_v19, %v3866_v24  ;;  %v930_v18 = vrot.slane %v3967_v17, 7  ;;  %v5610_v15 = vrot.slane %v3899_v43, 1 }
 0x12c   : > { %v2825_v23 = vpop.f32.mrb[10].mxu0  ;;  %v829_v34 = vrot.slane %v3990_v28, 1  ;;  %v884_v36 = vsel %vm856_vm1, %v827_v33, %v828_v30  ;;  %v3003_v49 = vpack.i.bf16 %v3990_v28, %v3965_v16  ;;  %v928_v56 = vrot.slane %v3990_v28, 7 }
 0x12d   : > { %2979 = vrot.lane.b32.xlu0 %v2968_v12, %s3567_s20  ;;  %v3988_v27 = vpop.f32.mrb[11].mxu0  ;;  %v4037_v55 = vsel %vm823_vm3, %v884_v36, 0.0  ;;  %v983_v60 = vsel %vm955_vm2, %v926_v63, %v927_v38  ;;  %v724_v3 = vmul.f32 %v3866_v24, %v614_v20  ;;  %v727_v10 = vmul.f32 %v2825_v23, %v3866_v24 }
 0x12e   : > { %2974 = vrot.lane.b32.xlu1 %v2973_v4, %s3566_s16  ;;  %v882_v39 = vsel %vm856_vm1, %v829_v34, %v830_v31  ;;  %v4018_v42 = vsel %vm856_vm1, %v828_v30, %v829_v34  ;;  %5574 = vst [vmem:[#allocation12_spill] sm:$0xff] %v4037_v55  ;;  %v3013_v63 = vpack.i.bf16 %v4037_v55, %v4056_v0  ;;  %v4074_v5 = vsel %vm921_vm4, %v983_v60, 0.0 }
 0x12f   : > { %5572 = vst [vmem:[#allocation10_spill] sm:$0xff] %v4018_v42  ;;  %v4022_v47 = vsel %vm823_vm3, %v882_v39, 0.0  ;;  %v4070_v53 = vsel %vm955_vm2, %v927_v38, %v928_v56  ;;  %v763_v19 = vadd.f32 %v3871_v7, %v724_v3  ;;  %v981_v23 = vsel %vm955_vm2, %v928_v56, %v929_v6 }
 0x130   : > { %5573 = vst [vmem:[#allocation11_spill] sm:$0xff] %v4022_v47  ;;  %5576 = vst [vmem:[#allocation14_spill] sm:$0xff] %v4070_v53  ;;  %v3018_v13 = vpack.i.bf16 %v4070_v53, %v4074_v5  ;;  %v765_v30 = vadd.f32 %v3871_v7, %v726_v8  ;;  %v766_v34 = vadd.f32 %v3871_v7, %v727_v10 }
 0x131   : > { %2984 = vrot.lane.b32.xlu0 %v2973_v4, %s3568_s10  ;;  %v725_v35 = vmul.f32 %v3866_v24, %v3988_v27  ;;  %v3028_v36 = vpack.i.bf16 %v4022_v47, %v4018_v42  ;;  %v4112_v39 = vsel %vm955_vm2, %v929_v6, %v930_v18  ;;  %v4121_v27 = vmax.f32 %v763_v19, 0.0 }
 0x132   : > { %2994 = vrot.lane.b32.xlu1 %v2993_v29, %s3567_s20  ;;  %v4009_v37 = vpop.f32.mrb[12].mxu0  ;;  %5577 = vst [vmem:[#allocation15_spill] sm:$0xff] %v4112_v39  ;;  %v4127_v56 = vmax.f32 %v766_v34, 0.0 }
 0x133   : > { %v630_v44 = vpop.f32.mrb[13].mxu0  ;;  %5579 = vst [vmem:[#allocation17_spill] sm:$0xff] %v4121_v27  ;;  %v764_v62 = vadd.f32 %v3871_v7, %v725_v35 }
 0x134   : > { %v728_v50 = vmul.f32 %v3866_v24, %v630_v44  ;;  %v4030_v51 = vpop.f32.mrb[14].mxu0  ;;  %v4116_v44 = vsel %vm921_vm4, %v981_v23, 0.0  ;;  %5581 = vst [vmem:[#allocation19_spill] sm:$0xff] %v4127_v56 }
 0x135   : > { %2989 = vrot.lane.b32.xlu0 %v2993_v29, %s3566_s16  ;;  %v633_v58 = vpop.f32.mrb[15].mxu0  ;;  %5578 = vst [vmem:[#allocation16_spill] sm:$0xff] %v4116_v44 }
 0x136   : > { %3004 = vrot.lane.b32.xlu1 %v3003_v49, %s3567_s20  ;;  %v4042_v59 = vadd.f32 %v3871_v7, %v728_v50  ;;  %v729_v61 = vmul.f32 %v3866_v24, %v633_v58  ;;  %v4125_v50 = vmax.f32 %v765_v30, 0.0  ;;  %v3033_v58 = vpack.i.bf16 %v4112_v39, %v4116_v44 }
 0x138   : > { %v4064_v2 = vadd.f32 %v3871_v7, %v729_v61  ;;  %5580 = vst [vmem:[#allocation18_spill] sm:$0xff] %v4125_v50  ;;  %v5595_v0 = vrot.slane %v4125_v50, 1 }
 0x139   : > { %2999 = vrot.lane.b32.xlu0 %v3003_v49, %s3566_s16 }
 0x13a   : > { %3014 = vrot.lane.b32.xlu1 %v3013_v63, %s3568_s10  ;;  %v2832_v9 = vpop.f32.mrb[16].mxu0 }
 0x13b   : > { %v734_v11 = vmul.f32 %v2832_v9, %v3866_v24  ;;  %v646_v12 = vpop.f32.mrb[17].mxu0  ;;  %v832_v9 = vrot.slane %v4121_v27, 1 }
 0x13c   : > { %v732_v20 = vmul.f32 %v3866_v24, %v646_v12  ;;  %v2833_v22 = vpop.f32.mrb[18].mxu0  ;;  %v3048_v12 = vpack.i.bf16 %v4127_v56, %v4125_v50 }
 0x13d   : > { %3009 = vrot.lane.b32.xlu0 %v3013_v63, %s3567_s20  ;;  %v4091_v4 = vadd.f32 %v3871_v7, %v734_v11  ;;  %v735_v25 = vmul.f32 %v2833_v22, %v3866_v24  ;;  %v649_v29 = vpop.f32.mrb[19].mxu0  ;;  %v4151_v22 = vmax.f32 %v764_v62, 0.0 }
 0x13e   : > { %3019 = vrot.lane.b32.xlu1 %v3018_v13, %s3568_s10  ;;  %v4097_v32 = vadd.f32 %v3871_v7, %v732_v20  ;;  %v733_v33 = vmul.f32 %v3866_v24, %v649_v29  ;;  %v831_v20 = vrot.slane %v3967_v17, 1 }
 0x13f   : > { %v4106_v38 = vadd.f32 %v3871_v7, %v735_v25  ;;  %5582 = vst [vmem:[#allocation20_spill] sm:$0xff] %v4151_v22  ;;  %v931_v25 = vrot.slane %v4121_v27, 7  ;;  %v3058_v30 = vpack.i.bf16 %v4151_v22, %v4121_v27  ;;  %v4294_v42 = vmax.f32 %v4091_v4, 0.0 }
 0x140   : > { %v4119_v48 = vadd.f32 %v3871_v7, %v733_v33  ;;  %v880_v23 = vsel %vm856_vm1, %v831_v20, %v832_v9  ;;  %v4297_v47 = vmax.f32 %v4097_v32, 0.0 }
 0x141   : > { %3029 = vrot.lane.b32.xlu0 %v3028_v36, %s3567_s20  ;;  %5593 = vst [vmem:[#allocation31_spill] sm:$0xff] %v4294_v42 }
 0x142   : > { %3024 = vrot.lane.b32.xlu1 %v3018_v13, %s3566_s16  ;;  %v2836_v49 = vpop.f32.mrb[20].mxu0  ;;  %5594 = vst [vmem:[#allocation32_spill] sm:$0xff] %v4297_v47 }
 0x143   : > { %v738_v60 = vmul.f32 %v2836_v49, %v3866_v24  ;;  %v662_v61 = vpop.f32.mrb[21].mxu0  ;;  %v4167_v49 = vsel %vm823_vm3, %v880_v23, 0.0 }
 0x144   : > { %v736_v1 = vmul.f32 %v3866_v24, %v662_v61  ;;  %v2837_v63 = vpop.f32.mrb[22].mxu0  ;;  %5583 = vst [vmem:[#allocation21_spill] sm:$0xff] %v4167_v49  ;;  %v833_v61 = vrot.slane %v4151_v22, 1 }
 0x145   : > { %3034 = vrot.lane.b32.xlu0 %v3033_v58, %s3568_s10  ;;  %v4136_v3 = vadd.f32 %v3871_v7, %v738_v60  ;;  %v739_v6 = vmul.f32 %v2837_v63, %v3866_v24  ;;  %v665_v8 = vpop.f32.mrb[23].mxu0  ;;  %v932_v60 = vrot.slane %v4151_v22, 7  ;;  %v979_v63 = vsel %vm955_vm2, %v930_v18, %v931_v25 }
 0x146   : > { %3039 = vrot.lane.b32.xlu1 %v3028_v36, %s3568_s10  ;;  %v4142_v10 = vadd.f32 %v3871_v7, %v736_v1  ;;  %v737_v11 = vmul.f32 %v3866_v24, %v665_v8  ;;  %v4225_v54 = vsel %vm856_vm1, %v832_v9, %v833_v61 }
 0x147   : > { %v4148_v13 = vadd.f32 %v3871_v7, %v739_v6  ;;  %v5503_v6 = vrot.slane %v4125_v50, 1  ;;  %5587 = vst [vmem:[#allocation25_spill] sm:$0xff] %v4225_v54 }
 0x148   : > { %v4154_v19 = vadd.f32 %v3871_v7, %v737_v11  ;;  %v4189_v11 = vsel %vm856_vm1, %v830_v31, %v831_v20  ;;  %v933_v20 = vrot.slane %v4125_v50, 7 }
 0x149   : > { %3049 = vrot.lane.b32.xlu0 %v3048_v12, %s3566_s16  ;;  %5584 = vst [vmem:[#allocation22_spill] sm:$0xff] %v4189_v11  ;;  %v3068_v18 = vpack.i.bf16 %v4167_v49, %v4189_v11  ;;  %v878_v31 = vsel %vm856_vm1, %v833_v61, %v5503_v6 }
 0x14a   : > { %3044 = vrot.lane.b32.xlu1 %v3033_v58, %s3566_s16  ;;  %v2840_v29 = vpop.f32.mrb[24].mxu0 }
 0x14b   : > { %v742_v33 = vmul.f32 %v2840_v29, %v3866_v24  ;;  %v678_v34 = vpop.f32.mrb[25].mxu0 }
 0x14c   : > { %v740_v35 = vmul.f32 %v3866_v24, %v678_v34  ;;  %v2841_v36 = vpop.f32.mrb[26].mxu0  ;;  %v4206_v34 = vsel %vm921_vm4, %v979_v63, 0.0 }
 0x14d   : > { %3059 = vrot.lane.b32.xlu0 %v3058_v30, %s3566_s16  ;;  %v4173_v58 = vadd.f32 %v3871_v7, %v742_v33  ;;  %v743_v62 = vmul.f32 %v2841_v36, %v3866_v24  ;;  %v681_v1 = vpop.f32.mrb[27].mxu0  ;;  %5586 = vst [vmem:[#allocation24_spill] sm:$0xff] %v4206_v34  ;;  %v731_v36 = vmul.f32 %v4030_v51, %v3866_v24 }
 0x14e   : > { %3054 = vrot.lane.b32.xlu1 %v3048_v12, %s3567_s20  ;;  %v4183_v8 = vadd.f32 %v3871_v7, %v740_v35  ;;  %v741_v23 = vmul.f32 %v3866_v24, %v681_v1  ;;  %v4202_v12 = vsel %vm955_vm2, %v931_v25, %v932_v60  ;;  %v730_v35 = vmul.f32 %v4009_v37, %v3866_v24 }
 0x14f   : > { %v4193_v29 = vadd.f32 %v3871_v7, %v743_v62  ;;  %5585 = vst [vmem:[#allocation23_spill] sm:$0xff] %v4202_v12  ;;  %v3078_v63 = vpack.i.bf16 %v4202_v12, %v4206_v34  ;;  %v4229_v37 = vsel %vm823_vm3, %v878_v31, 0.0  ;;  %v770_v31 = vadd.f32 %v3871_v7, %v731_v36 }
 0x150   : > { %v4198_v33 = vadd.f32 %v3871_v7, %v741_v23  ;;  %5588 = vst [vmem:[#allocation26_spill] sm:$0xff] %v4229_v37  ;;  %v769_v61 = vadd.f32 %v3871_v7, %v730_v35 }
 0x151   : > { %3069 = vrot.lane.b32.xlu0 %v3068_v18, %s3567_s20 }
 0x152   : > { %3064 = vrot.lane.b32.xlu1 %v3058_v30, %s3567_s20  ;;  %v2844_v25 = vpop.f32.mrb[28].mxu0  ;;  %v934_v30 = vrot.slane %v4127_v56, 7  ;;  %v4264_v36 = vmax.f32 %v769_v61, 0.0 }
 0x153   : > { %v746_v62 = vmul.f32 %v2844_v25, %v3866_v24  ;;  %v694_v1 = vpop.f32.mrb[29].mxu0 }
 0x154   : > { %v744_v23 = vmul.f32 %v3866_v24, %v694_v1  ;;  %v2845_v52 = vpop.f32.mrb[30].mxu0  ;;  %v977_v1 = vsel %vm955_vm2, %v932_v60, %v933_v20  ;;  %v4252_v6 = vsel %vm955_vm2, %v933_v20, %v934_v30 }
 0x155   : > { %v4233_v51 = vadd.f32 %v3871_v7, %v746_v62  ;;  %v747_v25 = vmul.f32 %v2845_v52, %v3866_v24  ;;  %3079 = vrot.lane.b32.xlu0 %v3078_v63, %s3568_s10  ;;  %v697_v57 = vpop.f32.mrb[31].mxu0  ;;  %v3088_v52 = vpack.i.bf16 %v4229_v37, %v4225_v54  ;;  %5589 = vst [vmem:[#allocation27_spill] sm:$0xff] %v4252_v6  ;;  %v4256_v60 = vsel %vm921_vm4, %v977_v1, 0.0 }
 0x156   : > { %v4240_v9 = vadd.f32 %v3871_v7, %v744_v23  ;;  %3074 = vrot.lane.b32.xlu1 %v3068_v18, %s3568_s10  ;;  %5590 = vst [vmem:[#allocation28_spill] sm:$0xff] %v4256_v60  ;;  %v4259_v18 = vmax.f32 %v4042_v59, 0.0  ;;  %v745_v35 = vmul.f32 %v3866_v24, %v697_v57  ;;  %v4266_v23 = vmax.f32 %v770_v31, 0.0 }
 0x157   : > { %v4246_v62 = vadd.f32 %v3871_v7, %v747_v25  ;;  %v3093_v20 = vpack.i.bf16 %v4252_v6, %v4256_v60  ;;  %v4274_v1 = vmax.f32 %v4064_v2, 0.0  ;;  %v835_v59 = vrot.slane %v4127_v56, 1 }
 0x158   : > { %5591 = vst [vmem:[#allocation29_spill] sm:$0xff] %v4259_v18  ;;  %v4271_v25 = vadd.f32 %v3871_v7, %v745_v35  ;;  %v836_v24 = vrot.slane %v4259_v18, 1  ;;  %v935_v57 = vrot.slane %v4259_v18, 7  ;;  %v5508_v7 = vrot.slane %v4264_v36, 1 }
 0x159   : > { %3089 = vrot.lane.b32.xlu0 %v3088_v52, %s3567_s20  ;;  %5592 = vst [vmem:[#allocation30_spill] sm:$0xff] %v4274_v1  ;;  %v837_v61 = vrot.slane %v4274_v1, 1  ;;  %v936_v31 = vrot.slane %v4274_v1, 7  ;;  %v937_v35 = vrot.slane %v4264_v36, 7  ;;  %v5511_v32 = vrot.slane %v4266_v23, 7 }
 0x15a   : > { %3084 = vrot.lane.b32.xlu1 %v3078_v63, %s3566_s16  ;;  %v3108_v63 = vpack.i.bf16 %v4266_v23, %v4264_v36  ;;  %v876_v2 = vsel %vm856_vm1, %v835_v59, %v836_v24 }
 0x15b   : > { %v874_v55 = vsel %vm856_vm1, %v837_v61, %v5508_v7  ;;  %v4313_v4 = vsel %vm823_vm3, %v876_v2, 0.0  ;;  %v4322_v7 = vsel %vm955_vm2, %v935_v57, %v936_v31  ;;  %v4334_v2 = vmax.f32 %v4136_v3, 0.0 }
 0x15c   : > { %5597 = vst [vmem:[#allocation34_spill] sm:$0xff] %v4313_v4  ;;  %5599 = vst [vmem:[#allocation36_spill] sm:$0xff] %v4322_v7  ;;  %v4354_v3 = vmax.f32 %v4154_v19, 0.0  ;;  %v842_v19 = vrot.slane %v4294_v42, 1 }
 0x15d   : > { %3094 = vrot.lane.b32.xlu0 %v3093_v20, %s3568_s10  ;;  %5602 = vst [vmem:[#allocation39_spill] sm:$0xff] %v4334_v2 }
 0x15e   : > { %3099 = vrot.lane.b32.xlu1 %v3088_v52, %s3568_s10  ;;  %v975_v52 = vsel %vm955_vm2, %v934_v30, %v935_v57  ;;  %v4317_v30 = vmax.f32 %v4106_v38, 0.0  ;;  %v4339_v38 = vsel %vm856_vm1, %v836_v24, %v837_v61  ;;  %v4343_v57 = vsel %vm823_vm3, %v874_v55, 0.0 }
 0x15f   : > { %5603 = vst [vmem:[#allocation40_spill] sm:$0xff] %v4339_v38  ;;  %5604 = vst [vmem:[#allocation41_spill] sm:$0xff] %v4343_v57  ;;  %v4362_v55 = vsel %vm955_vm2, %v937_v35, %v5511_v32  ;;  %v845_v60 = vrot.slane %v4354_v3, 1 }
 0x160   : > { %5598 = vst [vmem:[#allocation35_spill] sm:$0xff] %v4317_v30  ;;  %5606 = vst [vmem:[#allocation43_spill] sm:$0xff] %v4362_v55  ;;  %v843_v61 = vrot.slane %v4317_v30, 1 }
 0x161   : > { %3109 = vrot.lane.b32.xlu0 %v3108_v63, %s3566_s16  ;;  %v3113_v63 = vpack.i.bf16 %v4274_v1, %v4259_v18  ;;  %v4326_v18 = vsel %vm921_vm4, %v975_v52, 0.0  ;;  %v4346_v52 = vmax.f32 %v4142_v10, 0.0  ;;  %v839_v1 = vrot.slane %v4266_v23, 1 }
 0x162   : > { %3104 = vrot.lane.b32.xlu1 %v3093_v20, %s3566_s16  ;;  %v4309_v20 = vsel %vm856_vm1, %v5595_v0, %v835_v59  ;;  %5600 = vst [vmem:[#allocation37_spill] sm:$0xff] %v4326_v18  ;;  %v973_v0 = vsel %vm955_vm2, %v936_v31, %v937_v35  ;;  %v4331_v59 = vmax.f32 %v4119_v48, 0.0  ;;  %v4349_v31 = vmax.f32 %v4148_v13, 0.0 }
 0x163   : > { %5596 = vst [vmem:[#allocation33_spill] sm:$0xff] %v4309_v20  ;;  %v3123_v48 = vpack.i.bf16 %v4313_v4, %v4309_v20  ;;  %v3133_v24 = vpack.i.bf16 %v4322_v7, %v4326_v18  ;;  %v4366_v10 = vsel %vm921_vm4, %v973_v0, 0.0  ;;  %v3143_v13 = vpack.i.bf16 %v4343_v57, %v4339_v38 }
 0x164   : > { %5601 = vst [vmem:[#allocation38_spill] sm:$0xff] %v4331_v59  ;;  %5605 = vst [vmem:[#allocation42_spill] sm:$0xff] %v4349_v31  ;;  %v4377_v7 = vmax.f32 %v4183_v8, 0.0  ;;  %v3163_v35 = vpack.i.bf16 %v4317_v30, %v4294_v42  ;;  %v4383_v0 = vmax.f32 %v4198_v33, 0.0  ;;  %v3148_v32 = vpack.i.bf16 %v4362_v55, %v4366_v10 }
 0x165   : > { %3114 = vrot.lane.b32.xlu0 %v3113_v63, %s3566_s16  ;;  %5607 = vst [vmem:[#allocation44_spill] sm:$0xff] %v4366_v10  ;;  %v840_v18 = vrot.slane %v4297_v47, 1  ;;  %v4393_v8 = vmax.f32 %v4233_v51, 0.0  ;;  %v4401_v33 = vsel %vm856_vm1, %v842_v19, %v843_v61  ;;  %v841_v10 = vrot.slane %v4331_v59, 1 }
 0x166   : > { %3119 = vrot.lane.b32.xlu1 %v3113_v63, %s3567_s20  ;;  %v4374_v63 = vmax.f32 %v4173_v58, 0.0  ;;  %v4390_v58 = vmax.f32 %v4193_v29, 0.0  ;;  %5608 = vst [vmem:[#allocation45_spill] sm:$0xff] %v4401_v33  ;;  %v844_v6 = vrot.slane %v4346_v52, 1  ;;  %v4407_v29 = vmax.f32 %v4240_v9, 0.0 }
 0x167   : > { %v872_v50 = vsel %vm856_vm1, %v839_v1, %v840_v18  ;;  %v847_v56 = vrot.slane %v4349_v31, 1  ;;  %v848_v55 = vrot.slane %v4377_v7, 1  ;;  %v849_v12 = vrot.slane %v4383_v0, 1 }
 0x168   : > { %v850_v9 = vrot.slane %v4374_v63, 1  ;;  %v3178_v27 = vpack.i.bf16 %v4401_v33, %v4266_v23  ;;  %v4427_v22 = vsel %vm856_vm1, %v840_v18, %v841_v10  ;;  %v870_v39 = vsel %vm856_vm1, %v841_v10, %v842_v19 }
 0x169   : > { %3124 = vrot.lane.b32.xlu0 %v3123_v48, %s3567_s20  ;;  %5609 = vst [vmem:[#allocation46_spill] sm:$0xff] %v4427_v22  ;;  %v868_v44 = vsel %vm856_vm1, %v843_v61, %v844_v6  ;;  %v5611_v10 = vrot.slane %v4264_v36, 1  ;;  %v864_v61 = vsel %vm856_vm1, %v847_v56, %v848_v55  ;;  %v5614_v53 = vrot.slane %v4393_v8, 1 }
 0x16a   : > { %3129 = vrot.lane.b32.xlu1 %v3123_v48, %s3568_s10  ;;  %v4396_v48 = vmax.f32 %v4246_v62, 0.0  ;;  %v846_v62 = vrot.slane %v4334_v2, 1  ;;  %v4463_v18 = vsel %vm823_vm3, %v870_v39, 0.0  ;;  %v4482_v39 = vsel %vm823_vm3, %v868_v44, 0.0 }
 0x16b   : > { %v4447_v19 = vsel %vm856_vm1, %v5611_v10, %v839_v1  ;;  %5615 = vst [vmem:[#allocation49_spill] sm:$0xff] %v4463_v18  ;;  %v5616_v10 = vrot.slane %v4407_v29, 1  ;;  %5618 = vst [vmem:[#allocation51_spill] sm:$0xff] %v4482_v39  ;;  %v3233_v37 = vpack.i.bf16 %v4297_v47, %v4482_v39 }
 0x16c   : > { %v855_v51 = vrot.slane %v4396_v48, 1  ;;  %v866_v34 = vsel %vm856_vm1, %v845_v60, %v846_v62  ;;  %5612 = vst [vmem:[#allocation47_spill] sm:$0xff] %v4447_v19  ;;  %v4467_v1 = vsel %vm856_vm1, %v846_v62, %v847_v56  ;;  %v4495_v62 = vsel %vm823_vm3, %v864_v61, 0.0 }
 0x16d   : > { %3134 = vrot.lane.b32.xlu0 %v3133_v24, %s3568_s10  ;;  %v4486_v56 = vsel %vm823_vm3, %v866_v34, 0.0  ;;  %v5621_v61 = vrot.slane %v4266_v23, 7  ;;  %v942_v34 = vrot.slane %v4317_v30, 7  ;;  %v5543_v20 = vrot.slane %v4396_v48, 7 }
 0x16e   : > { %3139 = vrot.lane.b32.xlu1 %v3133_v24, %s3566_s16  ;;  %v851_v24 = vrot.slane %v4390_v58, 1  ;;  %v888_v17 = vsel %vm856_vm1, %v855_v51, %v5610_v15  ;;  %v4459_v15 = vsel %vm856_vm1, %v5614_v53, %v855_v51  ;;  %v4478_v53 = vsel %vm856_vm1, %v844_v6, %v845_v60  ;;  %5619 = vst [vmem:[#allocation52_spill] sm:$0xff] %v4486_v56 }
 0x16f   : > { %5617 = vst [vmem:[#allocation50_spill] sm:$0xff] %v4478_v53  ;;  %v4490_v51 = vsel %vm823_vm3, %v888_v17, 0.0  ;;  %v4499_v6 = vsel %vm856_vm1, %v848_v55, %v849_v12  ;;  %v3248_v57 = vpack.i.bf16 %v4478_v53, %v4331_v59 }
 0x170   : > { %v860_v11 = vsel %vm856_vm1, %v851_v24, %v5616_v10  ;;  %v4503_v44 = vsel %vm856_vm1, %v850_v9, %v851_v24  ;;  %v5620_v24 = vrot.slane %v4297_v47, 7  ;;  %v941_v10 = vrot.slane %v4294_v42, 7 }
 0x171   : > { %3144 = vrot.lane.b32.xlu0 %v3143_v13, %s3567_s20  ;;  %v4513_v60 = vsel %vm823_vm3, %v860_v11, 0.0  ;;  %v3168_v11 = vpack.i.bf16 %v4331_v59, %v4297_v47 }
 0x172   : > { %3154 = vrot.lane.b32.xlu1 %v3143_v13, %s3568_s10  ;;  %v4451_v13 = vsel %vm823_vm3, %v872_v50, 0.0  ;;  %v862_v50 = vsel %vm856_vm1, %v849_v12, %v850_v9  ;;  %v5530_v9 = vmov 0.0   ;;  %v5623_v55 = vmov %v5620_v24 }
 0x173   : > { %5613 = vst [vmem:[#allocation48_spill] sm:$0xff] %v4451_v13  ;;  %v4509_v17 = vsel %vm823_vm3, %v862_v50, 0.0  ;;  %v3193_v50 = vpack.i.bf16 %v4427_v22, %v5530_v9 }
 0x175   : > { %3149 = vrot.lane.b32.xlu0 %v3148_v32, %s3568_s10 }
 0x176   : > { %3159 = vrot.lane.b32.xlu1 %v3148_v32, %s3566_s16 }
 0x179   : > { %3164 = vrot.lane.b32.xlu0 %v3163_v35, %s3566_s16  ;;  %v971_v35 = vsel %vm955_vm2, %v5621_v61, %v5620_v24 }
 0x17a   : > { %3179 = vrot.lane.b32.xlu1 %v3178_v27, %s3567_s20  ;;  %v5622_v27 = vrot.slane %v4331_v59, 7  ;;  %v4560_v61 = vsel %vm921_vm4, %v971_v35, 0.0 }
 0x17b   : > { %5625 = vst [vmem:[#allocation54_spill] sm:$0xff] %v4560_v61 }
 0x17c   : > { %v4556_v24 = vsel %vm955_vm2, %v5623_v55, %v5622_v27  ;;  %v5626_v12 = vmov %v5622_v27  ;;  %v4573_v55 = vsel %vm955_vm2, %v941_v10, %v942_v34  ;;  %v5629_v27 = vmov 0.0  }
 0x17d   : > { %3169 = vrot.lane.b32.xlu0 %v3168_v11, %s3566_s16  ;;  %5624 = vst [vmem:[#allocation53_spill] sm:$0xff] %v4556_v24  ;;  %v969_v32 = vsel %vm955_vm2, %v5626_v12, %v941_v10  ;;  %v3173_v11 = vpack.i.bf16 %v4451_v13, %v4447_v19  ;;  %v3198_v9 = vpack.i.bf16 %v4556_v24, %v4560_v61  ;;  %5627 = vst [vmem:[#allocation55_spill] sm:$0xff] %v4573_v55 }
 0x17e   : > { %3194 = vrot.lane.b32.xlu1 %v3193_v50, %s3567_s20  ;;  %v4578_v50 = vsel %vm921_vm4, %v969_v32, 0.0  ;;  %v943_v12 = vrot.slane %v4346_v52, 7  ;;  %v3183_v35 = vpack.i.bf16 %v4447_v19, %v4573_v55  ;;  %v3208_v19 = vpack.i.bf16 %v4264_v36, %v4463_v18 }
 0x17f   : > { %5628 = vst [vmem:[#allocation56_spill] sm:$0xff] %v4578_v50  ;;  %v3203_v38 = vpack.i.bf16 %v4578_v50, %v5629_v27  ;;  %v3213_v32 = vpack.i.bf16 %v4573_v55, %v4578_v50  ;;  %v5635_v50 = vrot.slane %v3906_v46, 7 }
 0x180   : > { %v967_v10 = vsel %vm955_vm2, %v942_v34, %v943_v12  ;;  %v944_v34 = vrot.slane %v4354_v3, 7 }
 0x181   : > { %3174 = vrot.lane.b32.xlu0 %v3173_v11, %s3567_s20  ;;  %v4595_v11 = vsel %vm921_vm4, %v967_v10, 0.0  ;;  %v3238_v10 = vpack.i.bf16 %v4467_v1, %v4317_v30 }
 0x182   : > { %3199 = vrot.lane.b32.xlu1 %v3198_v9, %s3566_s16  ;;  %5630 = vst [vmem:[#allocation57_spill] sm:$0xff] %v4595_v11 }
 0x185   : > { %3184 = vrot.lane.b32.xlu0 %v3183_v35, %s3568_s10  ;;  %v3218_v35 = vpack.i.bf16 %v4349_v31, %v4334_v2 }
 0x186   : > { %3204 = vrot.lane.b32.xlu1 %v3203_v38, %s3568_s10  ;;  %v3228_v38 = vpack.i.bf16 %v4595_v11, %v4451_v13  ;;  %v3223_v13 = vpack.i.bf16 %v4354_v3, %v4346_v52 }
 0x189   : > { %3189 = vrot.lane.b32.xlu0 %v3198_v9, %s3568_s10  ;;  %v945_v9 = vrot.slane %v4334_v2, 7 }
 0x18a   : > { %3214 = vrot.lane.b32.xlu1 %v3213_v32, %s3566_s16 }
 0x18b   : > { %v965_v32 = vsel %vm955_vm2, %v944_v34, %v945_v9 }
 0x18d   : > { %3209 = vrot.lane.b32.xlu0 %v3208_v19, %s3567_s20  ;;  %v946_v19 = vrot.slane %v4349_v31, 7 }
 0x18e   : > { %3229 = vrot.lane.b32.xlu1 %v3228_v38, %s3568_s10  ;;  %v5540_v38 = vrot.slane %v4377_v7, 7 }
 0x191   : > { %3219 = vrot.lane.b32.xlu0 %v3218_v35, %s3566_s16  ;;  %v4623_v35 = vsel %vm921_vm4, %v965_v32, 0.0  ;;  %v4639_v32 = vsel %vm955_vm2, %v945_v9, %v946_v19  ;;  %v4655_v9 = vld [vmem:[%s5497_s6 + $0x80] sm:$0xff]  }
 0x192   : > { %3239 = vrot.lane.b32.xlu1 %v3238_v10, %s3567_s20  ;;  %5631 = vst [vmem:[#allocation58_spill] sm:$0xff] %v4623_v35  ;;  %v963_v10 = vsel %vm955_vm2, %v946_v19, %v5540_v38  ;;  %5632 = vst [vmem:[#allocation59_spill] sm:$0xff] %v4639_v32  ;;  %2846 = vmatprep.subr.bf16.mxu0 %v4655_v9 }
 0x193   : > { %v4645_v38 = vsel %vm921_vm4, %v963_v10, 0.0  ;;  %5633 = vst [vmem:[#allocation60_spill] sm:$0xff] %v4655_v9 }
 0x194   : > { %v3268_v10 = vpack.i.bf16 %v4645_v38, %v4482_v39 }
 0x195   : > { %3224 = vrot.lane.b32.xlu0 %v3223_v13, %s3566_s16  ;;  %v3258_v13 = vpack.i.bf16 %v4623_v35, %v4463_v18 }
 0x196   : > { %3249 = vrot.lane.b32.xlu1 %v3248_v57, %s3567_s20  ;;  %v923_v57 = vrot.slane %v3899_v43, 7 }
 0x197   : > { %v2960_v4 = vpop.permute.xlu0 %2959  ;;  %v4631_v54 = vpop.permute.xlu1 %2954 }
 0x198   : > { %v987_v49 = vsel %vm955_vm2, %v5543_v20, %v923_v57  ;;  %v986_v39 = vsel %vm955_vm2, %v923_v57, %v5635_v50  ;;  %v2962_v24 = vunpack.i.h.bf16 %v2960_v4 }
 0x199   : > { %3234 = vrot.lane.b32.xlu0 %v3233_v37, %s3567_s20  ;;  %v3243_v37 = vpack.i.bf16 %v4401_v33, %v4639_v32  ;;  %v988_v20 = vsel %vm921_vm4, %v987_v49, 0.0  ;;  %v948_v49 = vrot.slane %v4383_v0, 7 }
 0x19a   : > { %3259 = vrot.lane.b32.xlu1 %v3258_v13, %s3568_s10  ;;  %v4667_v13 = vsel %vm955_vm2, %v943_v12, %v944_v34  ;;  %v3273_v34 = vpack.i.bf16 %v986_v39, %v988_v20 }
 0x19b   : > { %v4657_v19 = vpop.permute.xlu0 %2964  ;;  %5634 = vst [vmem:[#allocation61_spill] sm:$0xff] %v4667_v13  ;;  %v3253_v33 = vpack.i.bf16 %v4427_v22, %v4667_v13  ;;  %v3263_v22 = vpack.i.bf16 %v4294_v42, %v4486_v56 }
 0x19c   : > { %v4661_v18 = vpop.permute.xlu1 %2969 }
 0x19d   : > { %3244 = vrot.lane.b32.xlu0 %v3243_v37, %s3568_s10  ;;  %v949_v37 = vrot.slane %v4374_v63, 7 }
 0x19e   : > { %3269 = vrot.lane.b32.xlu1 %v3268_v10, %s3568_s10 }
 0x19f   : > { %v2980_v55 = vpop.permute.xlu0 %2979 }
 0x1a0   : > { %v4680_v12 = vpop.permute.xlu1 %2974  ;;  %v2982_v9 = vunpack.i.h.bf16 %v2980_v55  ;;  %v2981_v30 = vunpack.i.l.bf16 %v2980_v55  ;;  %v3278_v55 = vpack.i.bf16 %v4667_v13, %v4595_v11 }
 0x1a1   : > { %3254 = vrot.lane.b32.xlu0 %v3253_v33, %s3568_s10  ;;  %v2961_v33 = vunpack.i.l.bf16 %v2960_v4 }
 0x1a2   : > { %3274 = vrot.lane.b32.xlu1 %v3273_v34, %s3566_s16  ;;  %v1775_v34 = vsel %vm499_vm0, %v3906_v46, %v2982_v9  ;;  %v1774_v59 = vsel %vm499_vm0, %v3899_v43, %v2981_v30  ;;  %v3283_v46 = vpack.i.bf16 %v4346_v52, %v4495_v62 }
 0x1a3   : > { %v2985_v10 = vpop.permute.xlu0 %2984 }
 0x1a4   : > { %v2987_v61 = vunpack.i.h.bf16 %v2985_v10  ;;  %v2986_v50 = vunpack.i.l.bf16 %v2985_v10  ;;  %v4688_v57 = vpop.permute.xlu1 %2994  ;;  %v961_v10 = vsel %vm955_vm2, %v948_v49, %v949_v37 }
 0x1a5   : > { %3264 = vrot.lane.b32.xlu0 %v3263_v22, %s3567_s20 }
 0x1a6   : > { %v1806_v42 = vsel %vm1709_vm5, %v1774_v59, %v2986_v50  ;;  %v1807_v47 = vsel %vm1709_vm5, %v1775_v34, %v2987_v61  ;;  %3279 = vrot.lane.b32.xlu1 %v3278_v55, %s3566_s16  ;;  %v3288_v59 = vpack.i.bf16 %v4499_v6, %v4354_v3  ;;  %v5636_v61 = vrot.slane %v4377_v7, 7 }
 0x1a7   : > { %v4702_v13 = vpop.permute.xlu0 %2989  ;;  %v1838_v4 = vsel %vm1741_vm6, %v1806_v42, %v2961_v33  ;;  %v1839_v43 = vsel %vm1741_vm6, %v1807_v47, %v2962_v24  ;;  %v4721_v50 = vsel %vm921_vm4, %v961_v10, 0.0  ;;  %v950_v42 = vrot.slane %v4390_v58, 7 }
 0x1a8   : > { %v4708_v22 = vpop.permute.xlu1 %3004  ;;  %v1871_v30 = vpack.c.bf16 %v1839_v43, %v1838_v4  ;;  %v4716_v9 = vsel %vm955_vm2, %v5636_v61, %v948_v49  ;;  %v5558_v47 = vrot.slane %v4407_v29, 7  ;;  %v2967_v24 = vunpack.i.h.bf16 %v4657_v19 }
 0x1a9   : > { %3284 = vrot.lane.b32.xlu0 %v3283_v46, %s3567_s20  ;;  %v2966_v55 = vunpack.i.l.bf16 %v4657_v19  ;;  %v3293_v49 = vpack.i.bf16 %v4478_v53, %v4716_v9  ;;  %v3298_v10 = vpack.i.bf16 %v4721_v50, %v4486_v56  ;;  %v2972_v46 = vunpack.i.h.bf16 %v4661_v18 }
 0x1aa   : > { %2149 = vmatprep.mubr.bf16.mxu0 %v1871_v30  ;;  %3289 = vrot.lane.b32.xlu1 %v3288_v59, %s3567_s20  ;;  %v2971_v4 = vunpack.i.l.bf16 %v4661_v18  ;;  %v959_v19 = vsel %vm955_vm2, %v950_v42, %v5558_v47  ;;  %v1680_v43 = vsel %vm499_vm0, %v986_v39, %v2967_v24  ;;  %v3303_v59 = vpack.i.bf16 %v4383_v0, %v4377_v7 }
 0x1ab   : > { %v3000_v33 = vpop.permute.xlu0 %2999  ;;  %v1679_v30 = vsel %vm499_vm0, %v988_v20, %v2966_v55  ;;  %v3308_v61 = vpack.i.bf16 %v4639_v32, %v4623_v35  ;;  %v2977_v18 = vunpack.i.h.bf16 %v4680_v12  ;;  %v3318_v47 = vpack.i.bf16 %v4503_v44, %v4349_v31 }
 0x1ac   : > { %v4730_v34 = vpop.permute.xlu1 %3014  ;;  %v4754_v39 = vsel %vm955_vm2, %v949_v37, %v950_v42  ;;  %v4760_v56 = vsel %vm921_vm4, %v959_v19, 0.0  ;;  %v1711_v35 = vsel %vm1709_vm5, %v1679_v30, %v2971_v4  ;;  %v1712_v31 = vsel %vm1709_vm5, %v1680_v43, %v2972_v46 }
 0x1ad   : > { %3294 = vrot.lane.b32.xlu0 %v3293_v49, %s3568_s10  ;;  %v2976_v49 = vunpack.i.l.bf16 %v4680_v12  ;;  %v3002_v37 = vunpack.i.h.bf16 %v3000_v33  ;;  %v3001_v42 = vunpack.i.l.bf16 %v3000_v33  ;;  %v1745_v4 = vsel %vm1741_vm6, %v1712_v31, %v2977_v18 }
 0x1ae   : > { %3299 = vrot.lane.b32.xlu1 %v3298_v10, %s3568_s10  ;;  %v3313_v10 = vpack.i.bf16 %v4334_v2, %v4509_v17  ;;  %v2957_v46 = vunpack.i.h.bf16 %v4631_v54  ;;  %v2956_v33 = vunpack.i.l.bf16 %v4631_v54  ;;  %v3333_v54 = vpack.i.bf16 %v4390_v58, %v4374_v63 }
 0x1af   : > { %v3010_v53 = vpop.permute.xlu0 %3009 }
 0x1b0   : > { %v3012_v20 = vunpack.i.h.bf16 %v3010_v53  ;;  %v3011_v24 = vunpack.i.l.bf16 %v3010_v53  ;;  %v3020_v55 = vpop.permute.xlu1 %3019 }
 0x1b1   : > { %v3022_v32 = vunpack.i.h.bf16 %v3020_v55  ;;  %v3021_v12 = vunpack.i.l.bf16 %v3020_v55  ;;  %3304 = vrot.lane.b32.xlu0 %v3303_v59, %s3566_s16  ;;  %v1744_v59 = vsel %vm1741_vm6, %v1711_v35, %v2976_v49  ;;  %v3016_v35 = vunpack.i.l.bf16 %v4730_v34 }
 0x1b2   : > { %3309 = vrot.lane.b32.xlu1 %v3308_v61, %s3566_s16  ;;  %v1776_v53 = vsel %vm499_vm0, %v3896_v41, %v3011_v24  ;;  %v1777_v11 = vsel %vm499_vm0, %v3902_v45, %v3012_v20  ;;  %v1873_v31 = vpack.c.bf16 %v1745_v4, %v1744_v59  ;;  %v3323_v49 = vpack.i.bf16 %v4467_v1, %v4754_v39 }
 0x1b3   : > { %v3030_v19 = vpop.permute.xlu0 %3029  ;;  %v1808_v2 = vsel %vm1709_vm5, %v1776_v53, %v3021_v12  ;;  %v1809_v55 = vsel %vm1709_vm5, %v1777_v11, %v3022_v32  ;;  %v3017_v11 = vunpack.i.h.bf16 %v4730_v34  ;;  %v3328_v24 = vpack.i.bf16 %v4760_v56, %v4495_v62 }
 0x1b4   : > { %v3025_v43 = vpop.permute.xlu1 %3024  ;;  %v1840_v30 = vsel %vm1741_vm6, %v1808_v2, %v3001_v42  ;;  %v1841_v41 = vsel %vm1741_vm6, %v1809_v55, %v3002_v37  ;;  %v3032_v61 = vunpack.i.h.bf16 %v3030_v19  ;;  %v3031_v45 = vunpack.i.l.bf16 %v3030_v19 }
 0x1b5   : > { %3314 = vrot.lane.b32.xlu0 %v3313_v10, %s3567_s20  ;;  %v1874_v20 = vpack.c.bf16 %v1841_v41, %v1840_v30  ;;  %v3027_v32 = vunpack.i.h.bf16 %v3025_v43  ;;  %v3026_v18 = vunpack.i.l.bf16 %v3025_v43  ;;  %v1681_v10 = vsel %vm499_vm0, %v3961_v14, %v2956_v33 }
 0x1b6   : > { %3319 = vrot.lane.b32.xlu1 %v3318_v47, %s3567_s20  ;;  %v1682_v47 = vsel %vm499_vm0, %v3977_v21, %v2957_v46  ;;  %v2992_v42 = vunpack.i.h.bf16 %v4702_v13  ;;  %v2991_v53 = vunpack.i.l.bf16 %v4702_v13  ;;  %v1779_v19 = vsel %vm499_vm0, %v3990_v28, %v3032_v61 }
 0x1b7   : > { %2157 = vmatprep.mubr.bf16.mxu1 %v1874_v20  ;;  %v3035_v2 = vpop.permute.xlu0 %3034  ;;  %v1778_v55 = vsel %vm499_vm0, %v3965_v16, %v3031_v45  ;;  %v1714_v14 = vsel %vm1709_vm5, %v1682_v47, %v3017_v11  ;;  %v1713_v21 = vsel %vm1709_vm5, %v1681_v10, %v3016_v35  ;;  %v4811_v43 = vmax.f32 %v4271_v25, 0.0 }
 0x1b8   : > { %v3037_v34 = vunpack.i.h.bf16 %v3035_v2  ;;  %v3036_v12 = vunpack.i.l.bf16 %v3035_v2  ;;  %v3040_v37 = vpop.permute.xlu1 %3039  ;;  %2158 = vmatmul.mubr.bf16.vlgmr.msra.gmra.mrb[0].mxu1 %v1873_v31  ;;  %v1746_v16 = vsel %vm1741_vm6, %v1713_v21, %v3026_v18  ;;  %v1747_v33 = vsel %vm1741_vm6, %v1714_v14, %v3027_v32 }
 0x1b9   : > { %3324 = vrot.lane.b32.xlu0 %v3323_v49, %s3568_s10  ;;  %v3338_v41 = vpack.i.bf16 %v4716_v9, %v4645_v38  ;;  %v1876_v45 = vpack.c.bf16 %v1747_v33, %v1746_v16  ;;  %v3343_v11 = vpack.i.bf16 %v4377_v7, %v4513_v60  ;;  %v953_v35 = vrot.slane %v4393_v8, 7 }
 0x1ba   : > { %v1810_v59 = vsel %vm1709_vm5, %v1778_v55, %v3036_v12  ;;  %v1811_v4 = vsel %vm1709_vm5, %v1779_v19, %v3037_v34  ;;  %3329 = vrot.lane.b32.xlu1 %v3328_v24, %s3568_s10  ;;  %v3353_v25 = vpack.i.bf16 %v4754_v39, %v4721_v50  ;;  %v853_v32 = vrot.slane %v4811_v43, 1 }
 0x1bb   : > { %v4804_v46 = vpop.permute.xlu0 %3049  ;;  %v1842_v13 = vsel %vm1741_vm6, %v1810_v59, %v2991_v53  ;;  %v1843_v28 = vsel %vm1741_vm6, %v1811_v4, %v2992_v42  ;;  %v3007_v18 = vunpack.i.h.bf16 %v4708_v22  ;;  %v3006_v2 = vunpack.i.l.bf16 %v4708_v22 }
 0x1bc   : > { %v3045_v30 = vpop.permute.xlu1 %3044  ;;  %v1877_v61 = vpack.c.bf16 %v1843_v28, %v1842_v13  ;;  %v3348_v49 = vpack.i.bf16 %v4811_v43, %v4407_v29  ;;  %v3042_v24 = vunpack.i.h.bf16 %v3040_v37  ;;  %v3041_v10 = vunpack.i.l.bf16 %v3040_v37  ;;  %v5639_v13 = vld [vmem:[#allocation14_spill] sm:$0xff] }
 0x1bd   : > { %3334 = vrot.lane.b32.xlu0 %v3333_v54, %s3566_s16  ;;  %v952_v54 = vrot.slane %v4811_v43, 7  ;;  %v3358_v34 = vpack.i.bf16 %v4459_v15, %v4390_v58  ;;  %v5637_v12 = vrot.slane %v4396_v48, 7  ;;  %v3047_v53 = vunpack.i.h.bf16 %v3045_v30 }
 0x1be   : > { %3339 = vrot.lane.b32.xlu1 %v3338_v41, %s3566_s16  ;;  %2165 = vmatprep.mubr.bf16.mxu1 %v1877_v61  ;;  %v3046_v19 = vunpack.i.l.bf16 %v3045_v30  ;;  %v5638_v55 = vrot.slane %v4407_v29, 1  ;;  %v1683_v4 = vsel %vm499_vm0, %v4074_v5, %v3006_v2  ;;  %v1684_v28 = vsel %vm499_vm0, %v5639_v13, %v3007_v18 }
 0x1bf   : > { %v3060_v20 = vpop.permute.xlu0 %3059  ;;  %v4838_v42 = vsel %vm955_vm2, %v953_v35, %v5637_v12  ;;  %v957_v37 = vsel %vm955_vm2, %v952_v54, %v953_v35  ;;  %v5640_v33 = vrot.slane %v4407_v29, 7  ;;  %v1716_v41 = vsel %vm1709_vm5, %v1684_v28, %v3042_v24  ;;  %v5641_v24 = vld [vmem:[#allocation9_spill] sm:$0xff] }
 0x1c0   : > { %v4820_v31 = vpop.permute.xlu1 %3054  ;;  %2166 = vmatmul.mubr.bf16.gmra.mrb[4].mxu1 %v1876_v45  ;;  %v4846_v14 = vsel %vm856_vm1, %v5638_v55, %v853_v32  ;;  %v3363_v16 = vpack.i.bf16 %v4503_v44, %v4838_v42  ;;  %v1715_v61 = vsel %vm1709_vm5, %v1683_v4, %v3041_v10 }
 0x1c1   : > { %3344 = vrot.lane.b32.xlu0 %v3343_v11, %s3567_s20  ;;  %v4862_v30 = vsel %vm955_vm2, %v5640_v33, %v952_v54  ;;  %v3368_v5 = vpack.i.bf16 %v4846_v14, %v4383_v0  ;;  %v4870_v11 = vsel %vm921_vm4, %v957_v37, 0.0  ;;  %v1748_v2 = vsel %vm1741_vm6, %v1715_v61, %v3046_v19 }
 0x1c2   : > { %3354 = vrot.lane.b32.xlu1 %v3353_v25, %s3566_s16  ;;  %v1749_v54 = vsel %vm1741_vm6, %v1716_v41, %v3047_v53  ;;  %v3373_v19 = vpack.i.bf16 %v4499_v6, %v4862_v30  ;;  %v2997_v53 = vunpack.i.h.bf16 %v4688_v57  ;;  %v5643_v41 = vrot.slane %v4393_v8, 1 }
 0x1c3   : > { %v3070_v47 = vpop.permute.xlu0 %3069  ;;  %v1879_v33 = vpack.c.bf16 %v1749_v54, %v1748_v2  ;;  %v5644_v2 = vld [vmem:[#allocation16_spill] sm:$0xff] }
 0x1c4   : > { %v4840_v22 = vpop.permute.xlu1 %3064  ;;  %v3072_v21 = vunpack.i.h.bf16 %v3070_v47  ;;  %v3071_v59 = vunpack.i.l.bf16 %v3070_v47  ;;  %v3061_v47 = vunpack.i.l.bf16 %v3060_v20  ;;  %v858_v61 = vsel %vm856_vm1, %v853_v32, %v5643_v41 }
 0x1c5   : > { %3349 = vrot.lane.b32.xlu0 %v3348_v49, %s3566_s16  ;;  %v3062_v49 = vunpack.i.h.bf16 %v3060_v20  ;;  %v2996_v20 = vunpack.i.l.bf16 %v4688_v57 }
 0x1c6   : > { %3359 = vrot.lane.b32.xlu1 %v3358_v34, %s3567_s20  ;;  %v1781_v10 = vsel %vm499_vm0, %v5641_v24, %v3072_v21  ;;  %v5642_v34 = vld [vmem:[#allocation8_spill] sm:$0xff]  ;;  %v5645_v24 = vld [vmem:[#allocation15_spill] sm:$0xff] }
 0x1c7   : > { %v3080_v45 = vpop.permute.xlu0 %3079  ;;  %v1780_v12 = vsel %vm499_vm0, %v5642_v34, %v3071_v59  ;;  %v1685_v54 = vsel %vm499_vm0, %v5644_v2, %v2996_v20  ;;  %v1686_v26 = vsel %vm499_vm0, %v5645_v24, %v2997_v53  ;;  %v3052_v34 = vunpack.i.h.bf16 %v4804_v46 }
 0x1c8   : > { %v3082_v35 = vunpack.i.h.bf16 %v3080_v45  ;;  %v3081_v25 = vunpack.i.l.bf16 %v3080_v45  ;;  %v3075_v18 = vpop.permute.xlu1 %3074  ;;  %v3066_v24 = vunpack.i.l.bf16 %v4840_v22 }
 0x1c9   : > { %3364 = vrot.lane.b32.xlu0 %v3363_v16, %s3568_s10  ;;  %v3378_v16 = vpack.i.bf16 %v4870_v11, %v4509_v17  ;;  %v3077_v45 = vunpack.i.h.bf16 %v3075_v18 }
 0x1ca   : > { %v1813_v55 = vsel %vm1709_vm5, %v1781_v10, %v3082_v35  ;;  %v1812_v37 = vsel %vm1709_vm5, %v1780_v12, %v3081_v25  ;;  %3369 = vrot.lane.b32.xlu1 %v3368_v5, %s3567_s20  ;;  %v3076_v5 = vunpack.i.l.bf16 %v3075_v18  ;;  %v3383_v18 = vpack.i.bf16 %v4846_v14, %v4513_v60 }
 0x1cb   : > { %v3090_v4 = vpop.permute.xlu0 %3089  ;;  %v1844_v21 = vsel %vm1741_vm6, %v1812_v37, %v3061_v47  ;;  %v1845_v59 = vsel %vm1741_vm6, %v1813_v55, %v3062_v49  ;;  %v3388_v49 = vpack.i.bf16 %v4396_v48, %v4393_v8  ;;  %v4906_v10 = vsel %vm823_vm3, %v858_v61, 0.0 }
 0x1cc   : > { %v3085_v13 = vpop.permute.xlu1 %3084  ;;  %v1880_v28 = vpack.c.bf16 %v1845_v59, %v1844_v21  ;;  %v3092_v35 = vunpack.i.h.bf16 %v3090_v4  ;;  %v3091_v57 = vunpack.i.l.bf16 %v3090_v4  ;;  %v3051_v12 = vunpack.i.l.bf16 %v4804_v46  ;;  %v5646_v4 = vld [vmem:[#allocation20_spill] sm:$0xff]  ;;  %v5647_v59 = vld [vmem:[#allocation17_spill] sm:$0xff] }
 0x1cd   : > { %3374 = vrot.lane.b32.xlu0 %v3373_v19, %s3568_s10  ;;  %v3087_v25 = vunpack.i.h.bf16 %v3085_v13  ;;  %v3086_v47 = vunpack.i.l.bf16 %v3085_v13  ;;  %v1718_v20 = vsel %vm1709_vm5, %v1686_v26, %v3077_v45  ;;  %v1717_v53 = vsel %vm1709_vm5, %v1685_v54, %v3076_v5 }
 0x1ce   : > { %2173 = vmatprep.mubr.bf16.mxu1 %v1880_v28  ;;  %3379 = vrot.lane.b32.xlu1 %v3378_v16, %s3568_s10  ;;  %v1783_v21 = vsel %vm499_vm0, %v5646_v4, %v3092_v35  ;;  %v1782_v13 = vsel %vm499_vm0, %v5647_v59, %v3091_v57  ;;  %v3398_v41 = vpack.i.bf16 %v4374_v63, %v4906_v10  ;;  %v3067_v54 = vunpack.i.h.bf16 %v4840_v22  ;;  %v5648_v4 = vld [vmem:[#allocation24_spill] sm:$0xff] }
 0x1cf   : > { %v3095_v32 = vpop.permute.xlu0 %3094  ;;  %2174 = vmatmul.mubr.bf16.gmra.mrb[8].mxu1 %v1879_v33  ;;  %v1750_v46 = vsel %vm1741_vm6, %v1717_v53, %v3086_v47  ;;  %v1751_v16 = vsel %vm1741_vm6, %v1718_v20, %v3087_v25  ;;  %v3393_v57 = vpack.i.bf16 %v4862_v30, %v4760_v56  ;;  %v3403_v47 = vpack.i.bf16 %v4407_v29, %v4490_v51 }
 0x1d0   : > { %v3097_v55 = vunpack.i.h.bf16 %v3095_v32  ;;  %v3096_v37 = vunpack.i.l.bf16 %v3095_v32  ;;  %v3100_v19 = vpop.permute.xlu1 %3099  ;;  %v1687_v22 = vsel %vm499_vm0, %v5648_v4, %v3066_v24  ;;  %v3056_v24 = vunpack.i.l.bf16 %v4820_v31 }
 0x1d1   : > { %3389 = vrot.lane.b32.xlu0 %v3388_v49, %s3566_s16  ;;  %v1882_v49 = vpack.c.bf16 %v1751_v16, %v1750_v46  ;;  %v3102_v26 = vunpack.i.h.bf16 %v3100_v19  ;;  %v3101_v32 = vunpack.i.l.bf16 %v3100_v19 }
 0x1d2   : > { %v1814_v40 = vsel %vm1709_vm5, %v1782_v13, %v3096_v37  ;;  %v1815_v28 = vsel %vm1709_vm5, %v1783_v21, %v3097_v55  ;;  %3384 = vrot.lane.b32.xlu1 %v3383_v18, %s3568_s10  ;;  %v3408_v37 = vpack.i.bf16 %v4870_v11, %v5629_v27  ;;  %v5649_v21 = vld [vmem:[#allocation23_spill] sm:$0xff] }
 0x1d3   : > { %v4922_v33 = vpop.permute.xlu0 %3109  ;;  %v1846_v61 = vsel %vm1741_vm6, %v1814_v40, %v3051_v12  ;;  %v1847_v45 = vsel %vm1741_vm6, %v1815_v28, %v3052_v34  ;;  %v1688_v59 = vsel %vm499_vm0, %v5649_v21, %v3067_v54  ;;  %v1719_v13 = vsel %vm1709_vm5, %v1687_v22, %v3101_v32  ;;  %v5652_v21 = vld [vmem:[#allocation28_spill] sm:$0xff] }
 0x1d4   : > { %v3105_v5 = vpop.permute.xlu1 %3104  ;;  %v1883_v35 = vpack.c.bf16 %v1847_v45, %v1846_v61  ;;  %v1720_v19 = vsel %vm1709_vm5, %v1688_v59, %v3102_v26  ;;  %v5650_v45 = vld [vmem:[#allocation19_spill] sm:$0xff]  ;;  %v3057_v54 = vunpack.i.h.bf16 %v4820_v31  ;;  %v1689_v59 = vsel %vm499_vm0, %v5652_v21, %v3056_v24 }
 0x1d5   : > { %3399 = vrot.lane.b32.xlu0 %v3398_v41, %s3567_s20  ;;  %v3107_v34 = vunpack.i.h.bf16 %v3105_v5  ;;  %v3106_v12 = vunpack.i.l.bf16 %v3105_v5 }
 0x1d6   : > { %2181 = vmatprep.mubr.bf16.mxu1 %v1883_v35  ;;  %3394 = vrot.lane.b32.xlu1 %v3393_v57, %s3566_s16  ;;  %v5651_v35 = vld [vmem:[#allocation18_spill] sm:$0xff] }
 0x1d7   : > { %v3115_v25 = vpop.permute.xlu0 %3114  ;;  %2182 = vmatmul.mubr.bf16.gmra.mrb[12].mxu1 %v1882_v49  ;;  %v1752_v46 = vsel %vm1741_vm6, %v1719_v13, %v3106_v12  ;;  %v1753_v16 = vsel %vm1741_vm6, %v1720_v19, %v3107_v34  ;;  %v5653_v19 = vld [vmem:[#allocation27_spill] sm:$0xff] }
 0x1d8   : > { %v4934_v2 = vpop.permute.xlu1 %3119  ;;  %v3117_v41 = vunpack.i.h.bf16 %v3115_v25  ;;  %v3116_v61 = vunpack.i.l.bf16 %v3115_v25  ;;  %v1885_v12 = vpack.c.bf16 %v1753_v16, %v1752_v46  ;;  %v1690_v31 = vsel %vm499_vm0, %v5653_v19, %v3057_v54 }
 0x1d9   : > { %3404 = vrot.lane.b32.xlu0 %v3403_v47, %s3567_s20 }
 0x1da   : > { %1111 = vrot.lane.b32.xlu1 %v4811_v43, %s3567_s20 }
 0x1db   : > { %v3125_v18 = vpop.permute.xlu0 %3124 }
 0x1dc   : > { %v3130_v55 = vpop.permute.xlu1 %3129  ;;  %v3127_v20 = vunpack.i.h.bf16 %v3125_v18  ;;  %v3126_v53 = vunpack.i.l.bf16 %v3125_v18 }
 0x1dd   : > { %1234 = vrot.lane.b32.xlu0 %v4906_v10, %s3568_s10 }
 0x1de   : > { %3409 = vrot.lane.b32.xlu1 %v3408_v37, %s3566_s16  ;;  %v1785_v5 = vsel %vm499_vm0, %v5650_v45, %v3127_v20  ;;  %v1784_v57 = vsel %vm499_vm0, %v5651_v35, %v3126_v53  ;;  %v3132_v37 = vunpack.i.h.bf16 %v3130_v55  ;;  %v3131_v20 = vunpack.i.l.bf16 %v3130_v55  ;;  %v5655_v45 = vld [vmem:[#allocation29_spill] sm:$0xff] }
 0x1df   : > { %v3135_v40 = vpop.permute.xlu0 %3134 }
 0x1e0   : > { %v3137_v28 = vunpack.i.h.bf16 %v3135_v40  ;;  %v3136_v27 = vunpack.i.l.bf16 %v3135_v40  ;;  %v3140_v11 = vpop.permute.xlu1 %3139  ;;  %v3112_v40 = vunpack.i.h.bf16 %v4922_v33  ;;  %v1722_v16 = vsel %vm1709_vm5, %v1690_v31, %v3132_v37 }
 0x1e1   : > { %1361 = vrot.lane.b32.xlu0 %v4838_v42, %s3566_s16  ;;  %v3142_v4 = vunpack.i.h.bf16 %v3140_v11  ;;  %v3141_v22 = vunpack.i.l.bf16 %v3140_v11  ;;  %v1721_v11 = vsel %vm1709_vm5, %v1689_v59, %v3131_v20  ;;  %s3571_s16 = smov [#allocation5]  }
 0x1e2   : > { %v1817_v49 = vsel %vm1709_vm5, %v1785_v5, %v3137_v28  ;;  %v1816_v47 = vsel %vm1709_vm5, %v1784_v57, %v3136_v27  ;;  %v3111_v28 = vunpack.i.l.bf16 %v4922_v33  ;;  %s3499_s20 = sshll.u32 %s3571_s16, 4  ;;  %s3500_s20 = int_to_ptr.vmem [resolvable:$false] %s3499_s20 }
 0x1e3   : > { %v3145_v26 = vpop.permute.xlu0 %3144  ;;  %v1848_v25 = vsel %vm1741_vm6, %v1816_v47, %v3116_v61  ;;  %v1849_v32 = vsel %vm1741_vm6, %v1817_v49, %v3117_v41  ;;  %v5654_v41 = vld [vmem:[#allocation30_spill] sm:$0xff]  ;;  %v1754_v49 = vsel %vm1741_vm6, %v1721_v11, %v3141_v22  ;;  %v1755_v33 = vsel %vm1741_vm6, %v1722_v16, %v3142_v4  ;;  %s3501_s10 = scalar_lea.vmem %s3500_s20, 8192  ;;  %p3502_p8 = scmp.lt.s32.totalorder %s5440_s19, %s3500_s20 }
 0x1e4   : > { %v3155_v18 = vpop.permute.xlu1 %3154  ;;  %v1886_v34 = vpack.c.bf16 %v1849_v32, %v1848_v25  ;;  %v3147_v53 = vunpack.i.h.bf16 %v3145_v26  ;;  %v3146_v42 = vunpack.i.l.bf16 %v3145_v26  ;;  %v1888_v32 = vpack.c.bf16 %v1755_v33, %v1754_v49  ;;  %p3503_p10 = scmp.lt.s32.totalorder %s3501_s10, %s3495_s15 }
 0x1e5   : > { %v3157_v4 = vunpack.i.h.bf16 %v3155_v18  ;;  %v3156_v22 = vunpack.i.l.bf16 %v3155_v18 }
 0x1e6   : > { %2189 = vmatprep.mubr.bf16.mxu1 %v1886_v34  ;;  %v1787_v61 = vsel %vm499_vm0, %v5654_v41, %v3147_v53  ;;  %v1786_v5 = vsel %vm499_vm0, %v5655_v45, %v3146_v42  ;;  %v3122_v53 = vunpack.i.h.bf16 %v4934_v2  ;;  %v3121_v42 = vunpack.i.l.bf16 %v4934_v2  ;;  %p3504_p0 = por %p3503_p10, %p3502_p8 }
 0x1e7   : > { %v3150_v13 = vpop.permute.xlu0 %3149  ;;  %2190 = vmatmul.mubr.bf16.gmra.mrb[16].mxu1 %v1885_v12 }
 0x1e8   : > { %v3152_v27 = vunpack.i.h.bf16 %v3150_v13  ;;  %v3151_v46 = vunpack.i.l.bf16 %v3150_v13  ;;  %v3160_v55 = vpop.permute.xlu1 %3159  ;;  %v5656_v13 = vld [vmem:[#allocation37_spill] sm:$0xff]  ;;  %p3505_p2 = pnand %p3504_p0, %p3498_p13 }
 0x1e9   : > { %v3162_v21 = vunpack.i.h.bf16 %v3160_v55  ;;  %v3161_v59 = vunpack.i.l.bf16 %v3160_v55 }
 0x1ea   : > { %v1818_v35 = vsel %vm1709_vm5, %v1786_v5, %v3151_v46  ;;  %v1819_v57 = vsel %vm1709_vm5, %v1787_v61, %v3152_v27 }
 0x1eb   : > { %v4982_v47 = vpop.permute.xlu0 %3164  ;;  %v1850_v54 = vsel %vm1741_vm6, %v1818_v35, %v3111_v28  ;;  %v1851_v24 = vsel %vm1741_vm6, %v1819_v57, %v3112_v40  ;;  %v1691_v40 = vsel %vm499_vm0, %v5656_v13, %v3121_v42  ;;  %v5657_v28 = vld [vmem:[#allocation36_spill] sm:$0xff] }
 0x1ec   : > { %v4986_v26 = vpop.permute.xlu1 %3179  ;;  %v1889_v25 = vpack.c.bf16 %v1851_v24, %v1850_v54  ;;  %v1692_v27 = vsel %vm499_vm0, %v5657_v28, %v3122_v53  ;;  %v1723_v41 = vsel %vm1709_vm5, %v1691_v40, %v3156_v22  ;;  %v3167_v53 = vunpack.i.h.bf16 %v4982_v47 }
 0x1ed   : > { %v1724_v11 = vsel %vm1709_vm5, %v1692_v27, %v3157_v4  ;;  %v1756_v2 = vsel %vm1741_vm6, %v1723_v41, %v3161_v59  ;;  %v5659_v41 = vld [vmem:[#allocation43_spill] sm:$0xff] }
 0x1ee   : > { %2197 = vmatprep.mubr.bf16.mxu1 %v1889_v25  ;;  %v1757_v18 = vsel %vm1741_vm6, %v1724_v11, %v3162_v21  ;;  %v3181_v25 = vunpack.i.l.bf16 %v4986_v26  ;;  %v5658_v21 = vld [vmem:[#allocation32_spill] sm:$0xff]  ;;  %v3166_v11 = vunpack.i.l.bf16 %v4982_v47 }
 0x1ef   : > { %v3170_v34 = vpop.permute.xlu0 %3169  ;;  %2198 = vmatmul.mubr.bf16.gmra.mrb[20].mxu1 %v1888_v32  ;;  %v1891_v22 = vpack.c.bf16 %v1757_v18, %v1756_v2  ;;  %v5661_v18 = vld [vmem:[#allocation38_spill] sm:$0xff] }
 0x1f0   : > { %v4988_v12 = vpop.permute.xlu1 %3194  ;;  %v3172_v55 = vunpack.i.h.bf16 %v3170_v34  ;;  %v3171_v49 = vunpack.i.l.bf16 %v3170_v34 }
 0x1f1   : > { %v3197_v45 = vunpack.i.h.bf16 %v4988_v12 }
 0x1f3   : > { %v3175_v37 = vpop.permute.xlu0 %3174 }
 0x1f4   : > { %v4990_v20 = vpop.permute.xlu1 %3199  ;;  %v3177_v46 = vunpack.i.h.bf16 %v3175_v37  ;;  %v3176_v16 = vunpack.i.l.bf16 %v3175_v37 }
 0x1f5   : > { %v3202_v47 = vunpack.i.h.bf16 %v4990_v20 }
 0x1f6   : > { %v1789_v33 = vsel %vm499_vm0, %v4266_v23, %v3177_v46  ;;  %v1788_v54 = vsel %vm499_vm0, %v4264_v36, %v3176_v16  ;;  %v1790_v23 = vsel %vm499_vm0, %v5658_v21, %v3197_v45  ;;  %v3196_v21 = vunpack.i.l.bf16 %v4988_v12 }
 0x1f7   : > { %v3185_v19 = vpop.permute.xlu0 %3184 }
 0x1f8   : > { %v3205_v31 = vpop.permute.xlu1 %3204  ;;  %v3187_v28 = vunpack.i.h.bf16 %v3185_v19  ;;  %v3186_v27 = vunpack.i.l.bf16 %v3185_v19 }
 0x1f9   : > { %v3207_v24 = vunpack.i.h.bf16 %v3205_v31 }
 0x1fb   : > { %v3190_v61 = vpop.permute.xlu0 %3189  ;;  %v1822_v46 = vsel %vm1709_vm5, %v1790_v23, %v3207_v24 }
 0x1fc   : > { %v3192_v5 = vunpack.i.h.bf16 %v3190_v61  ;;  %v3191_v35 = vunpack.i.l.bf16 %v3190_v61  ;;  %v5003_v57 = vpop.permute.xlu1 %3214  ;;  %v1694_v61 = vsel %vm499_vm0, %v5659_v41, %v3181_v25  ;;  %v1854_v24 = vsel %vm1741_vm6, %v1822_v46, %v3166_v11  ;;  %v5663_v11 = vld [vmem:[#allocation12_spill] sm:$0xff] }
 0x1fe   : > { %v1821_v32 = vsel %vm1709_vm5, %v1789_v33, %v3192_v5  ;;  %v1820_v37 = vsel %vm1709_vm5, %v1788_v54, %v3191_v35  ;;  %v5660_v5 = vld [vmem:[#allocation44_spill] sm:$0xff]  ;;  %v3201_v33 = vunpack.i.l.bf16 %v4990_v20  ;;  %v3182_v20 = vunpack.i.h.bf16 %v4986_v26 }
 0x1ff   : > { %v3210_v42 = vpop.permute.xlu0 %3209  ;;  %v1852_v4 = vsel %vm1741_vm6, %v1820_v37, %v3171_v49  ;;  %v1853_v34 = vsel %vm1741_vm6, %v1821_v32, %v3172_v55 }
 0x200   : > { %v3212_v59 = vunpack.i.h.bf16 %v3210_v42  ;;  %v3211_v36 = vunpack.i.l.bf16 %v3210_v42  ;;  %v3230_v13 = vpop.permute.xlu1 %3229  ;;  %v1892_v40 = vpack.c.bf16 %v1853_v34, %v1852_v4 }
 0x201   : > { %v3231_v16 = vunpack.i.l.bf16 %v3230_v13 }
 0x202   : > { %v1693_v2 = vsel %vm499_vm0, %v5660_v5, %v3212_v59  ;;  %v1791_v55 = vsel %vm499_vm0, %v5661_v18, %v3211_v36  ;;  %2205 = vmatprep.mubr.bf16.mxu1 %v1892_v40  ;;  %v5040_v59 = vunpack.i.l.bf16 %v3205_v31  ;;  %v3232_v40 = vunpack.i.h.bf16 %v3230_v13 }
 0x203   : > { %v1726_v45 = vsel %vm1709_vm5, %v1694_v61, %v3231_v16  ;;  %v5026_v35 = vpop.permute.xlu0 %3219  ;;  %2206 = vmatmul.mubr.bf16.gmra.mrb[24].mxu1 %v1891_v22  ;;  %v1823_v19 = vsel %vm1709_vm5, %v1791_v55, %v3186_v27  ;;  %v1725_v49 = vsel %vm1709_vm5, %v1693_v2, %v3187_v28  ;;  %v1678_v28 = vsel %vm499_vm0, 0.0, %v3196_v21  ;;  %v5662_v16 = vld [vmem:[#allocation13_spill] sm:$0xff]  ;;  %v5664_v61 = vld [vmem:[#allocation31_spill] sm:$0xff] }
 0x204   : > { %v5032_v54 = vpop.permute.xlu1 %3239  ;;  %v1855_v25 = vsel %vm1741_vm6, %v1823_v19, %v3167_v53  ;;  %v1758_v37 = vsel %vm1741_vm6, %v1725_v49, %v3201_v33  ;;  %v1759_v42 = vsel %vm1741_vm6, %v1726_v45, %v3202_v47  ;;  %v1872_v41 = vpack.c.bf16 %v5663_v11, %v5662_v16  ;;  %v5665_v47 = vld [vmem:[#allocation53_spill] sm:$0xff] }
 0x205   : > { %v1895_v32 = vpack.c.bf16 %v1855_v25, %v1854_v24  ;;  %v1894_v22 = vpack.c.bf16 %v1759_v42, %v1758_v37  ;;  %v1792_v5 = vsel %vm499_vm0, %v5664_v61, %v3182_v20  ;;  %v1710_v12 = vsel %vm1709_vm5, %v1678_v28, %v5040_v59 }
 0x206   : > { %v3217_v13 = vunpack.i.h.bf16 %v5003_v57  ;;  %v3216_v18 = vunpack.i.l.bf16 %v5003_v57  ;;  %v1824_v19 = vsel %vm1709_vm5, %v1792_v5, %v3232_v40  ;;  %v3222_v49 = vunpack.i.h.bf16 %v5026_v35  ;;  %v5666_v40 = vld [vmem:[#allocation54_spill] sm:$0xff] }
 0x207   : > { %v3225_v4 = vpop.permute.xlu0 %3224  ;;  %2213 = vmatprep.mubr.bf16.mxu1 %v1895_v32  ;;  %v3221_v25 = vunpack.i.l.bf16 %v5026_v35  ;;  %v3241_v32 = vunpack.i.l.bf16 %v5032_v54 }
 0x208   : > { %v3250_v34 = vpop.permute.xlu1 %3249  ;;  %v3226_v2 = vunpack.i.l.bf16 %v3225_v4  ;;  %v3227_v37 = vunpack.i.h.bf16 %v3225_v4 }
 0x209   : > { %v3251_v53 = vunpack.i.l.bf16 %v3250_v34  ;;  %v3252_v26 = vunpack.i.h.bf16 %v3250_v34 }
 0x20a   : > { %v1856_v20 = vsel %vm1741_vm6, %v1824_v19, %v3226_v2 }
 0x20b   : > { %v3235_v23 = vpop.permute.xlu0 %3234  ;;  %2214 = vmatmul.mubr.bf16.gmra.mrb[28].mxu1 %v1894_v22  ;;  %v1696_v33 = vsel %vm499_vm0, %v5665_v47, %v3251_v53  ;;  %v1794_v57 = vsel %vm499_vm0, %v4346_v52, %v3252_v26 }
 0x20c   : > { %v3260_v36 = vpop.permute.xlu1 %3259  ;;  %v3237_v55 = vunpack.i.h.bf16 %v3235_v23  ;;  %v3236_v45 = vunpack.i.l.bf16 %v3235_v23 }
 0x20d   : > { %v3261_v27 = vunpack.i.l.bf16 %v3260_v36  ;;  %v3262_v24 = vunpack.i.h.bf16 %v3260_v36  ;;  %v5667_v36 = vld [vmem:[#allocation35_spill] sm:$0xff] }
 0x20e   : > { %v1695_v53 = vsel %vm499_vm0, %v5666_v40, %v3237_v55  ;;  %v1793_v35 = vsel %vm499_vm0, %v5667_v36, %v3236_v45  ;;  %v5669_v40 = vld [vmem:[#allocation60_spill] sm:$0xff]  ;;  %v5670_v36 = vld [vmem:[#allocation55_spill] sm:$0xff] }
 0x20f   : > { %v3245_v46 = vpop.permute.xlu0 %3244  ;;  %v1728_v42 = vsel %vm1709_vm5, %v1696_v33, %v3261_v27  ;;  %v1826_v4 = vsel %vm1709_vm5, %v1794_v57, %v3262_v24 }
 0x210   : > { %v5049_v31 = vpop.permute.xlu1 %3269  ;;  %v1761_v52 = vsel %vm1741_vm6, %v1728_v42, %v3217_v13  ;;  %v3247_v57 = vunpack.i.h.bf16 %v3245_v46  ;;  %v3246_v13 = vunpack.i.l.bf16 %v3245_v46 }
 0x211   : > { %v3271_v42 = vunpack.i.l.bf16 %v5049_v31 }
 0x213   : > { %v3255_v34 = vpop.permute.xlu0 %3254 }
 0x214   : > { %v3257_v22 = vunpack.i.h.bf16 %v3255_v34  ;;  %v3256_v21 = vunpack.i.l.bf16 %v3255_v34  ;;  %v3275_v23 = vpop.permute.xlu1 %3274  ;;  %v3432_v34 = vld [vmem:[%s5497_s6 + $0x88] sm:$0xff]  }
 0x215   : > { %v3277_v28 = vunpack.i.h.bf16 %v3275_v23  ;;  %v3276_v16 = vunpack.i.l.bf16 %v3275_v23 }
 0x216   : > { %v1727_v27 = vsel %vm1709_vm5, %v1695_v53, %v3257_v22  ;;  %v1825_v11 = vsel %vm1709_vm5, %v1793_v35, %v3256_v21  ;;  %v1698_v35 = vsel %vm499_vm0, %v5670_v36, %v3241_v32 }
 0x217   : > { %v1743_v61 = vsel %vm1741_vm6, %v1710_v12, %v3277_v28  ;;  %v1742_v5 = vsel %vm1741_vm6, %v1710_v12, %v3276_v16  ;;  %v3265_v2 = vpop.permute.xlu0 %3264  ;;  %v1857_v26 = vsel %vm1741_vm6, %v1825_v11, %v3227_v37  ;;  %v1760_v55 = vsel %vm1741_vm6, %v1727_v27, %v3216_v18  ;;  %v5668_v12 = vld [vmem:[#allocation56_spill] sm:$0xff] }
 0x218   : > { %v1870_v45 = vpack.c.bf16 %v1743_v61, %v1742_v5  ;;  %v3267_v19 = vunpack.i.h.bf16 %v3265_v2  ;;  %v3266_v47 = vunpack.i.l.bf16 %v3265_v2  ;;  %v3280_v33 = vpop.permute.xlu1 %3279  ;;  %v1898_v24 = vpack.c.bf16 %v1857_v26, %v1856_v20 }
 0x219   : > { %v1897_v22 = vpack.c.bf16 %v1761_v52, %v1760_v55  ;;  %v3282_v37 = vunpack.i.h.bf16 %v3280_v33  ;;  %v3281_v23 = vunpack.i.l.bf16 %v3280_v33  ;;  %v1730_v27 = vsel %vm1709_vm5, %v1698_v35, %v3271_v42  ;;  %v5672_v33 = vld [vmem:[#allocation11_spill] sm:$0xff]  ;;  %v5676_v42 = vld [vmem:[#allocation22_spill] sm:$0xff] }
 0x21a   : > { %v1697_v21 = vsel %vm499_vm0, %v5668_v12, %v3267_v19  ;;  %v1795_v18 = vsel %vm499_vm0, %v4354_v3, %v3266_v47  ;;  %2150 = vmatmul.mubr.bf16.vlgmr.msra.gmra.mrb[32].mxu0 %v1870_v45  ;;  %2221 = vmatprep.mubr.bf16.mxu1 %v1898_v24  ;;  %v1858_v3 = vsel %vm1741_vm6, %v1826_v4, %v3221_v25  ;;  %v3242_v52 = vunpack.i.h.bf16 %v5032_v54  ;;  %v5671_v45 = vld [vmem:[#allocation39_spill] sm:$0xff]  ;;  %v5673_v24 = vld [vmem:[#allocation10_spill] sm:$0xff]  ;;  %v5678_v12 = vld [vmem:[#allocation57_spill] sm:$0xff] }
 0x21b   : > { %v3285_v20 = vpop.permute.xlu0 %3284  ;;  %2222 = vmatmul.mubr.bf16.gmra.mrb[32].mxu1 %v1897_v22  ;;  %2847 = vmatpush3.bf16.msra.mxu0 %v5669_v40  ;;  %v1827_v53 = vsel %vm1709_vm5, %v1795_v18, %v3246_v13  ;;  %v1729_v46 = vsel %vm1709_vm5, %v1697_v21, %v3247_v57  ;;  %v1763_v5 = vsel %vm1741_vm6, %v1730_v27, %v3282_v37  ;;  %v3272_v2 = vunpack.i.h.bf16 %v5049_v31  ;;  %v5679_v18 = vld [vmem:[#allocation42_spill] sm:$0xff] }
 0x21c   : > { %2850 = vmatprep.mubr.msk.bf16.mxu0 %vm499_vm0, %v1872_v41  ;;  %v3290_v28 = vpop.permute.xlu1 %3289  ;;  %2848 = vmatprep.subr.bf16.mxu0 %v3432_v34  ;;  %v1859_v16 = vsel %vm1741_vm6, %v1827_v53, %v3222_v49  ;;  %v1762_v61 = vsel %vm1741_vm6, %v1729_v46, %v3281_v23  ;;  %v3287_v41 = vunpack.i.h.bf16 %v3285_v20  ;;  %v3286_v26 = vunpack.i.l.bf16 %v3285_v20  ;;  %v5680_v53 = vld [vmem:[#allocation61_spill] sm:$0xff] }
 0x21d   : > { %v1901_v11 = vpack.c.bf16 %v1859_v16, %v1858_v3  ;;  %v3291_v25 = vunpack.i.l.bf16 %v3290_v28  ;;  %v1900_v49 = vpack.c.bf16 %v1763_v5, %v1762_v61  ;;  %v1796_v19 = vsel %vm499_vm0, %v5671_v45, %v3242_v52 }
 0x21e   : > { %v5674_v57 = vpack.c.bf16 %v5672_v33, %v5673_v24  ;;  %v1828_v31 = vsel %vm1709_vm5, %v1796_v19, %v3272_v2  ;;  %v1699_v21 = vsel %vm499_vm0, %v5678_v12, %v3287_v41  ;;  %v1797_v37 = vsel %vm499_vm0, %v5679_v18, %v3286_v26  ;;  %v5685_v33 = vld [vmem:[#allocation33_spill] sm:$0xff]  ;;  %v5687_v18 = vld [vmem:[#allocation58_spill] sm:$0xff] }
 0x21f   : > { %v3295_v32 = vpop.permute.xlu0 %3294  ;;  %2229 = vmatprep.mubr.bf16.mxu1 %v1901_v11  ;;  %2849 = vmatpush3.bf16.msra.mxu0 %v3432_v34  ;;  %v5675_v34 = vld [vmem:[#allocation21_spill] sm:$0xff]  ;;  %v1700_v46 = vsel %vm499_vm0, %v5680_v53, %v3291_v25  ;;  %v3292_v25 = vunpack.i.h.bf16 %v3290_v28 }
 0x220   : > { %v3300_v55 = vpop.permute.xlu1 %3299  ;;  %v3296_v4 = vunpack.i.l.bf16 %v3295_v32  ;;  %v3297_v47 = vunpack.i.h.bf16 %v3295_v32  ;;  %v5677_v22 = vpack.c.bf16 %v5675_v34, %v5676_v42 }
 0x221   : > { %v3301_v54 = vunpack.i.l.bf16 %v3300_v55  ;;  %v3302_v19 = vunpack.i.h.bf16 %v3300_v55  ;;  %v1798_v28 = vsel %vm499_vm0, %v4377_v7, %v3292_v25 }
 0x222   : > { %2851 = vmatmul.mubr.msk.bf16.vlgmr.msra.gmra.mrb[36].mxu0 %vm499_vm0, %v5674_v57  ;;  %v1829_v36 = vsel %vm1709_vm5, %v1797_v37, %v3296_v4  ;;  %v1731_v16 = vsel %vm1709_vm5, %v1699_v21, %v3297_v47  ;;  %v5681_v4 = vld [vmem:[#allocation26_spill] sm:$0xff] }
 0x223   : > { %v3305_v13 = vpop.permute.xlu0 %3304  ;;  %2230 = vmatmul.mubr.bf16.gmra.mrb[36].mxu1 %v1900_v49  ;;  %2854 = vmatprep.mubr.msk.bf16.mxu0 %vm499_vm0, %v5677_v22  ;;  %v1732_v27 = vsel %vm1709_vm5, %v1700_v46, %v3301_v54  ;;  %v5682_v49 = vld [vmem:[#allocation25_spill] sm:$0xff]  ;;  %v5684_v54 = vld [vmem:[#allocation34_spill] sm:$0xff]  ;;  %v1830_v21 = vsel %vm1709_vm5, %v1798_v28, %v3302_v19  ;;  %v5688_v46 = vld [vmem:[#allocation59_spill] sm:$0xff] }
 0x224   : > { %v3307_v23 = vunpack.i.h.bf16 %v3305_v13  ;;  %v3306_v20 = vunpack.i.l.bf16 %v3305_v13  ;;  %v3310_v40 = vpop.permute.xlu1 %3309  ;;  %v5683_v45 = vpack.c.bf16 %v5681_v4, %v5682_v49  ;;  %v5686_v24 = vpack.c.bf16 %v5684_v54, %v5685_v33  ;;  %v5698_v28 = vld [vmem:[#allocation51_spill] sm:$0xff] }
 0x225   : > { %v3312_v35 = vunpack.i.h.bf16 %v3310_v40  ;;  %v3311_v3 = vunpack.i.l.bf16 %v3310_v40 }
 0x226   : > { %v1860_v11 = vsel %vm1741_vm6, %v1828_v31, %v3306_v20  ;;  %v1861_v52 = vsel %vm1741_vm6, %v1829_v36, %v3307_v23 }
 0x227   : > { %v3315_v61 = vpop.permute.xlu0 %3314  ;;  %v1904_v5 = vpack.c.bf16 %v1861_v52, %v1860_v11  ;;  %v1764_v2 = vsel %vm1741_vm6, %v1731_v16, %v3311_v3  ;;  %v1765_v32 = vsel %vm1741_vm6, %v1732_v27, %v3312_v35  ;;  %v5689_v11 = vld [vmem:[#allocation41_spill] sm:$0xff]  ;;  %v5690_v52 = vld [vmem:[#allocation40_spill] sm:$0xff] }
 0x228   : > { %v3320_v41 = vpop.permute.xlu1 %3319  ;;  %v1903_v26 = vpack.c.bf16 %v1765_v32, %v1764_v2  ;;  %v3317_v57 = vunpack.i.h.bf16 %v3315_v61  ;;  %v3316_v31 = vunpack.i.l.bf16 %v3315_v61  ;;  %v5691_v61 = vpack.c.bf16 %v5689_v11, %v5690_v52  ;;  %v5692_v32 = vld [vmem:[#allocation48_spill] sm:$0xff] }
 0x229   : > { %2237 = vmatprep.mubr.bf16.mxu1 %v1904_v5  ;;  %v3321_v34 = vunpack.i.l.bf16 %v3320_v41 }
 0x22a   : > { %2855 = vmatmul.mubr.msk.bf16.gmra.mrb[40].mxu0 %vm499_vm0, %v5683_v45  ;;  %v1701_v37 = vsel %vm499_vm0, %v5687_v18, %v3317_v57  ;;  %v1799_v23 = vsel %vm499_vm0, %v4383_v0, %v3316_v31  ;;  %v5695_v57 = vld [vmem:[#allocation49_spill] sm:$0xff]  ;;  %v5696_v31 = vld [vmem:[#allocation46_spill] sm:$0xff] }
 0x22b   : > { %v3325_v47 = vpop.permute.xlu0 %3324  ;;  %2238 = vmatmul.mubr.bf16.gmra.mrb[40].mxu1 %v1903_v26  ;;  %2858 = vmatprep.mubr.msk.bf16.mxu0 %vm499_vm0, %v5686_v24  ;;  %v1702_v36 = vsel %vm499_vm0, %v5688_v46, %v3321_v34  ;;  %v5693_v26 = vld [vmem:[#allocation47_spill] sm:$0xff]  ;;  %v3322_v24 = vunpack.i.h.bf16 %v3320_v41  ;;  %v5697_v34 = vpack.c.bf16 %v5695_v57, %v5696_v31 }
 0x22c   : > { %v3330_v13 = vpop.permute.xlu1 %3329  ;;  %v3326_v42 = vunpack.i.l.bf16 %v3325_v47  ;;  %v3327_v22 = vunpack.i.h.bf16 %v3325_v47  ;;  %v5694_v25 = vpack.c.bf16 %v5692_v32, %v5693_v26 }
 0x22d   : > { %v3331_v12 = vunpack.i.l.bf16 %v3330_v13 }
 0x22e   : > { %v1831_v35 = vsel %vm1709_vm5, %v1799_v23, %v3326_v42  ;;  %v1733_v16 = vsel %vm1709_vm5, %v1701_v37, %v3327_v22  ;;  %v3332_v42 = vunpack.i.h.bf16 %v3330_v13  ;;  %v5699_v22 = vld [vmem:[#allocation45_spill] sm:$0xff]  ;;  %v1800_v23 = vsel %vm499_vm0, %v4374_v63, %v3322_v24 }
 0x22f   : > { %v3335_v55 = vpop.permute.xlu0 %3334  ;;  %v1734_v27 = vsel %vm1709_vm5, %v1702_v36, %v3331_v12  ;;  %v5700_v12 = vpack.c.bf16 %v5698_v28, %v5699_v22 }
 0x230   : > { %v3337_v20 = vunpack.i.h.bf16 %v3335_v55  ;;  %v3336_v40 = vunpack.i.l.bf16 %v3335_v55  ;;  %v3340_v53 = vpop.permute.xlu1 %3339  ;;  %v1832_v41 = vsel %vm1709_vm5, %v1800_v23, %v3332_v42 }
 0x231   : > { %v3342_v7 = vunpack.i.h.bf16 %v3340_v53  ;;  %v3341_v3 = vunpack.i.l.bf16 %v3340_v53 }
 0x232   : > { %2859 = vmatmul.mubr.msk.bf16.gmra.mrb[44].mxu0 %vm499_vm0, %v5691_v61  ;;  %v1862_v0 = vsel %vm1741_vm6, %v1830_v21, %v3336_v40  ;;  %v1863_v5 = vsel %vm1741_vm6, %v1831_v35, %v3337_v20 }
 0x233   : > { %v3345_v2 = vpop.permute.xlu0 %3344  ;;  %2862 = vmatprep.mubr.msk.bf16.mxu0 %vm499_vm0, %v5694_v25  ;;  %v1907_v4 = vpack.c.bf16 %v1863_v5, %v1862_v0  ;;  %v1766_v49 = vsel %vm1741_vm6, %v1733_v16, %v3341_v3  ;;  %v1767_v45 = vsel %vm1741_vm6, %v1734_v27, %v3342_v7  ;;  %v5701_v5 = vld [vmem:[#allocation52_spill] sm:$0xff] }
 0x234   : > { %v3355_v19 = vpop.permute.xlu1 %3354  ;;  %v1906_v47 = vpack.c.bf16 %v1767_v45, %v1766_v49  ;;  %v3347_v18 = vunpack.i.h.bf16 %v3345_v2  ;;  %v3346_v37 = vunpack.i.l.bf16 %v3345_v2  ;;  %v5702_v2 = vld [vmem:[#allocation50_spill] sm:$0xff] }
 0x235   : > { %2245 = vmatprep.mubr.bf16.mxu1 %v1907_v4  ;;  %v3357_v46 = vunpack.i.h.bf16 %v3355_v19  ;;  %v3356_v36 = vunpack.i.l.bf16 %v3355_v19  ;;  %v5703_v32 = vpack.c.bf16 %v5701_v5, %v5702_v2 }
 0x236   : > { %2246 = vmatmul.mubr.bf16.gmra.mrb[44].mxu1 %v1906_v47  ;;  %v1703_v3 = vsel %vm499_vm0, %v4645_v38, %v3347_v18  ;;  %v1801_v16 = vsel %vm499_vm0, %v4390_v58, %v3346_v37  ;;  %v5704_v58 = vpack.c.bf16 %v4495_v62, %v4467_v1 }
 0x237   : > { %v3350_v54 = vpop.permute.xlu0 %3349 }
 0x238   : > { %v5152_v33 = vpop.permute.xlu1 %3359  ;;  %v3351_v40 = vunpack.i.l.bf16 %v3350_v54  ;;  %v3352_v27 = vunpack.i.h.bf16 %v3350_v54 }
 0x239   : > { %v3361_v63 = vunpack.i.l.bf16 %v5152_v33  ;;  %v3362_v1 = vunpack.i.h.bf16 %v5152_v33 }
 0x23a   : > { %2863 = vmatmul.mubr.msk.bf16.gmra.mrb[48].mxu0 %vm499_vm0, %v5697_v34  ;;  %v1864_v25 = vsel %vm1741_vm6, %v1832_v41, %v3351_v40 }
 0x23b   : > { %2866 = vmatprep.mubr.msk.bf16.mxu0 %vm499_vm0, %v5700_v12  ;;  %v3365_v21 = vpop.permute.xlu0 %3364  ;;  %v1706_v62 = vsel %vm499_vm0, %v4754_v39, %v3361_v63 }
 0x23c   : > { %v3370_v55 = vpop.permute.xlu1 %3369  ;;  %v3367_v42 = vunpack.i.h.bf16 %v3365_v21  ;;  %v3366_v18 = vunpack.i.l.bf16 %v3365_v21  ;;  %v5706_v21 = vpack.c.bf16 %v4513_v60, %v4503_v44  ;;  %v1804_v60 = vsel %vm499_vm0, %v4393_v8, %v3362_v1 }
 0x23d   : > { %v3371_v20 = vunpack.i.l.bf16 %v3370_v55  ;;  %v3372_v49 = vunpack.i.h.bf16 %v3370_v55 }
 0x23f   : > { %v3375_v53 = vpop.permute.xlu0 %3374  ;;  %v1704_v52 = vsel %vm499_vm0, %v4716_v9, %v3371_v20  ;;  %v1802_v28 = vsel %vm499_vm0, %v4407_v29, %v3372_v49  ;;  %v5705_v29 = vpack.c.bf16 %v4509_v17, %v4499_v6 }
 0x240   : > { %v3377_v13 = vunpack.i.h.bf16 %v3375_v53  ;;  %v3376_v35 = vunpack.i.l.bf16 %v3375_v53  ;;  %v3380_v7 = vpop.permute.xlu1 %3379 }
 0x241   : > { %v3381_v11 = vunpack.i.l.bf16 %v3380_v7  ;;  %v3382_v54 = vunpack.i.h.bf16 %v3380_v7 }
 0x242   : > { %v1735_v61 = vsel %vm1709_vm5, %v1703_v3, %v3377_v13  ;;  %v1833_v0 = vsel %vm1709_vm5, %v1801_v16, %v3376_v35  ;;  %2867 = vmatmul.mubr.msk.bf16.gmra.mrb[52].mxu0 %vm499_vm0, %v5703_v32 }
 0x243   : > { %v1736_v38 = vsel %vm1709_vm5, %v1704_v52, %v3381_v11  ;;  %2870 = vmatprep.mubr.msk.bf16.mxu0 %vm499_vm0, %v5704_v58  ;;  %v3390_v26 = vpop.permute.xlu0 %3389  ;;  %v1865_v9 = vsel %vm1741_vm6, %v1833_v0, %v3352_v27  ;;  %v1768_v4 = vsel %vm1741_vm6, %v1735_v61, %v3356_v36  ;;  %v1834_v37 = vsel %vm1709_vm5, %v1802_v28, %v3382_v54 }
 0x244   : > { %v3385_v45 = vpop.permute.xlu1 %3384  ;;  %v1910_v19 = vpack.c.bf16 %v1865_v9, %v1864_v25  ;;  %v1769_v47 = vsel %vm1741_vm6, %v1736_v38, %v3357_v46  ;;  %v3391_v31 = vunpack.i.l.bf16 %v3390_v26  ;;  %v3392_v41 = vunpack.i.h.bf16 %v3390_v26 }
 0x245   : > { %v1909_v24 = vpack.c.bf16 %v1769_v47, %v1768_v4  ;;  %v3386_v57 = vunpack.i.l.bf16 %v3385_v45  ;;  %v3387_v63 = vunpack.i.h.bf16 %v3385_v45  ;;  %v1911_v61 = vpack.c.bf16 %v4906_v10, %v4846_v14 }
 0x246   : > { %2253 = vmatprep.mubr.bf16.mxu1 %v1910_v19  ;;  %v1866_v36 = vsel %vm1741_vm6, %v1834_v37, %v3391_v31  ;;  %v5707_v10 = vpack.c.bf16 %v4490_v51, %v4459_v15 }
 0x247   : > { %2254 = vmatmul.mubr.bf16.gmra.mrb[48].mxu1 %v1909_v24  ;;  %v3400_v34 = vpop.permute.xlu0 %3399  ;;  %v1738_v33 = vsel %vm1709_vm5, %v1706_v62, %v3386_v57 }
 0x248   : > { %v3402_v22 = vunpack.i.h.bf16 %v3400_v34  ;;  %v3401_v12 = vunpack.i.l.bf16 %v3400_v34  ;;  %v3395_v55 = vpop.permute.xlu1 %3394 }
 0x249   : > { %v3397_v23 = vunpack.i.h.bf16 %v3395_v55  ;;  %v3396_v20 = vunpack.i.l.bf16 %v3395_v55 }
 0x24a   : > { %v1705_v39 = vsel %vm499_vm0, %v4721_v50, %v3402_v22  ;;  %v1803_v40 = vsel %vm499_vm0, %v4811_v43, %v3401_v12  ;;  %2871 = vmatmul.mubr.msk.bf16.gmra.mrb[56].mxu0 %vm499_vm0, %v5705_v29 }
 0x24b   : > { %2874 = vmatprep.mubr.msk.bf16.mxu0 %vm499_vm0, %v5706_v21  ;;  %v3405_v53 = vpop.permute.xlu0 %3404  ;;  %v1835_v46 = vsel %vm1709_vm5, %v1803_v40, %v3366_v18  ;;  %v1737_v50 = vsel %vm1709_vm5, %v1705_v39, %v3367_v42  ;;  %v1771_v13 = vsel %vm1741_vm6, %v1738_v33, %v3397_v23 }
 0x24c   : > { %v3407_v43 = vunpack.i.h.bf16 %v3405_v53  ;;  %v3406_v35 = vunpack.i.l.bf16 %v3405_v53  ;;  %v1112_v7 = vpop.permute.xlu1 %1111  ;;  %v1867_v6 = vsel %vm1741_vm6, %v1835_v46, %v3392_v41  ;;  %v1770_v17 = vsel %vm1741_vm6, %v1737_v50, %v3396_v20 }
 0x24d   : > { %v1913_v3 = vpack.c.bf16 %v1867_v6, %v1866_v36  ;;  %v1912_v44 = vpack.c.bf16 %v1771_v13, %v1770_v17  ;;  %v1708_v2 = vsel %vm499_vm0, %v4862_v30, %v1112_v7 }
 0x24e   : > { %v1707_v16 = vsel %vm499_vm0, %v4760_v56, %v3407_v43  ;;  %v1805_v27 = vsel %vm499_vm0, %v4396_v48, %v3406_v35  ;;  %v1836_v48 = vsel %vm1709_vm5, %v1804_v60, %v5040_v59 }
 0x24f   : > { %v1235_v11 = vpop.permute.xlu0 %1234  ;;  %2261 = vmatprep.mubr.bf16.mxu1 %v1913_v3  ;;  %v1739_v8 = vsel %vm1709_vm5, %v1707_v16, %v3387_v63  ;;  %v1837_v56 = vsel %vm1709_vm5, %v1805_v27, %v5040_v59  ;;  %v3570_v59 = vmov 0.0|0.0  }
 0x250   : > { %v3410_v52 = vpop.permute.xlu1 %3409  ;;  %2262 = vmatmul.mubr.bf16.gmra.mrb[52].mxu1 %v1912_v44  ;;  %v1740_v32 = vsel %vm1709_vm5, %v1708_v2, %v1235_v11 }
 0x251   : > { %v3412_v0 = vunpack.i.h.bf16 %v3410_v52  ;;  %v3411_v5 = vunpack.i.l.bf16 %v3410_v52 }
 0x252   : > { %2875 = vmatmul.mubr.msk.bf16.gmra.mrb[60].mxu0 %vm499_vm0, %v1911_v61 }
 0x253   : > { %v1362_v38 = vpop.permute.xlu0 %1361  ;;  %v1772_v14 = vsel %vm1741_vm6, %v1739_v8, %v3412_v0  ;;  %2878 = vmatprep.mubr.msk.bf16.mxu0 %vm499_vm0, %v5707_v10  ;;  %v1868_v30 = vsel %vm1741_vm6, %v1836_v48, %v3411_v5  ;;  %v1869_v58 = vsel %vm1741_vm6, %v1837_v56, %v3411_v5 }
 0x254   : > { %v1773_v26 = vsel %vm1741_vm6, %v1740_v32, %v1362_v38  ;;  %v1916_v25 = vpack.c.bf16 %v1869_v58, %v1868_v30  ;;  %v5270_v58 = vld [vmem:[%s5498_s7] ss:$0 sm:$0xff] }
 0x255   : > { %v1915_v9 = vpack.c.bf16 %v1773_v26, %v1772_v14 }
 0x256   : > { %2269 = vmatprep.mubr.bf16.mxu1 %v1916_v25 }
 0x258   : > { %2270 = vmatmul.mubr.bf16.gmra.mrb[56].mxu1 %v1915_v9 }
 0x25a   : > { %2879 = vmatmul.mubr.bf16.gmra.mrb[64].mxu0 %v3570_v59 }
 0x28b   : > { %v2702_v4 = vpop.f32.mrb[0].mxu1 }
 0x28c   : > { %v2703_v49 = vpop.f32.mrb[1].mxu1 }
 0x28d   : > { %v2704_v45 = vadd.f32 %v2703_v49, %v2702_v4  ;;  %v2705_v19 = vpop.f32.mrb[2].mxu1 }
 0x28e   : > { %v2706_v47 = vpop.f32.mrb[3].mxu1 }
 0x28f   : > { %v2707_v15 = vadd.f32 %v2706_v47, %v2705_v19  ;;  %v2160_v25 = vadd.f32 %v2704_v45, %v5270_v58 }
 0x291   : > { %v2163_v47 = vadd.f32 %v2707_v15, %v5270_v58  ;;  %v3435_v15 = vld [vmem:[%s3729_s25 + $0x18] sm:$0xff] }
 0x293   : > { %v2708_v51 = vpop.f32.mrb[4].mxu1 }
 0x294   : > { %v2709_v54 = vpop.f32.mrb[5].mxu1 }
 0x295   : > { %v5237_v24 = vadd.f32 %v2709_v54, %v2708_v51  ;;  %v2711_v57 = vpop.f32.mrb[6].mxu1 }
 0x296   : > { %v2712_v1 = vpop.f32.mrb[7].mxu1 }
 0x297   : > { %v5239_v62 = vadd.f32 %v2712_v1, %v2711_v57 }
 0x2a2   : > { %v2714_v31 = vpop.f32.mrb[8].mxu1 }
 0x2a3   : > { %v2715_v34 = vpop.f32.mrb[9].mxu1 }
 0x2a4   : > { %v5241_v42 = vadd.f32 %v2715_v34, %v2714_v31  ;;  %v2717_v28 = vpop.f32.mrb[10].mxu1  ;;  %v3433_v31 = vld [vmem:[%s3729_s25 + $0x10] sm:$0xff] }
 0x2a5   : > { %v2718_v22 = vpop.f32.mrb[11].mxu1 }
 0x2a6   : > { %v5243_v12 = vadd.f32 %v2718_v22, %v2717_v28 }
 0x2aa   : > { %v2720_v55 = vpop.f32.mrb[12].mxu1 }
 0x2ab   : > { %v2721_v18 = vpop.f32.mrb[13].mxu1 }
 0x2ac   : > { %v5245_v37 = vadd.f32 %v2721_v18, %v2720_v55  ;;  %v2723_v23 = vpop.f32.mrb[14].mxu1  ;;  %v3434_v18 = vld [vmem:[%s3729_s25] sm:$0xff] }
 0x2ad   : > { %v2724_v20 = vpop.f32.mrb[15].mxu1 }
 0x2ae   : > { %v5247_v41 = vadd.f32 %v2724_v20, %v2723_v23 }
 0x2ba   : > { %v2726_v33 = vpop.f32.mrb[16].mxu1 }
 0x2bb   : > { %v2727_v39 = vpop.f32.mrb[17].mxu1 }
 0x2bc   : > { %v5249_v40 = vadd.f32 %v2727_v39, %v2726_v33  ;;  %v2729_v29 = vpop.f32.mrb[18].mxu1 }
 0x2bd   : > { %v2730_v21 = vpop.f32.mrb[19].mxu1 }
 0x2be   : > { %v5251_v53 = vadd.f32 %v2730_v21, %v2729_v29  ;;  %v3436_v21 = vld [vmem:[%s3729_s25 + $0x8] sm:$0xff] }
 0x2c2   : > { %v2732_v46 = vpop.f32.mrb[20].mxu1 }
 0x2c3   : > { %v2733_v36 = vpop.f32.mrb[21].mxu1 }
 0x2c4   : > { %v5253_v50 = vadd.f32 %v2733_v36, %v2732_v46  ;;  %v2735_v13 = vpop.f32.mrb[22].mxu1  ;;  %v2176_v36 = vadd.f32 %v5241_v42, %v5270_v58  ;;  %v2171_v42 = vadd.f32 %v5239_v62, %v5270_v58 }
 0x2c5   : > { %v2736_v43 = vpop.f32.mrb[23].mxu1 }
 0x2c6   : > { %v5255_v35 = vadd.f32 %v2736_v43, %v2735_v13  ;;  %v2168_v43 = vadd.f32 %v5237_v24, %v5270_v58 }
 0x2d6   : > { %v2738_v7 = vpop.f32.mrb[24].mxu1 }
 0x2d7   : > { %v2739_v6 = vpop.f32.mrb[25].mxu1 }
 0x2d8   : > { %v5257_v17 = vadd.f32 %v2739_v6, %v2738_v7  ;;  %v2741_v3 = vpop.f32.mrb[26].mxu1 }
 0x2d9   : > { %v2742_v44 = vpop.f32.mrb[27].mxu1 }
 0x2da   : > { %v5259_v60 = vadd.f32 %v2742_v44, %v2741_v3  ;;  %v2179_v44 = vadd.f32 %v5243_v12, %v5270_v58 }
 0x2de   : > { %v2744_v16 = vpop.f32.mrb[28].mxu1 }
 0x2df   : > { %v2745_v27 = vpop.f32.mrb[29].mxu1 }
 0x2e0   : > { %v5261_v11 = vadd.f32 %v2745_v27, %v2744_v16  ;;  %v2747_v63 = vpop.f32.mrb[30].mxu1 }
 0x2e1   : > { %v2748_v52 = vpop.f32.mrb[31].mxu1 }
 0x2e2   : > { %v5263_v61 = vadd.f32 %v2748_v52, %v2747_v63  ;;  %v3437_v52 = vld [vmem:[%s3729_s25 + $0x30] sm:$0xff] }
 0x2ed   : > { %v2696_v0 = vpop.f32.mrb[32].mxu0 }
 0x2ee   : > { %v2697_v5 = vpop.f32.mrb[33].mxu0  ;;  %v2750_v2 = vpop.f32.mrb[32].mxu1 }
 0x2ef   : > { %v2698_v8 = vadd.f32 %v2697_v5, %v2696_v0  ;;  %v2699_v48 = vpop.f32.mrb[34].mxu0  ;;  %v2751_v56 = vpop.f32.mrb[33].mxu1 }
 0x2f0   : > { %v5265_v32 = vadd.f32 %v2751_v56, %v2750_v2  ;;  %v2700_v38 = vpop.f32.mrb[35].mxu0  ;;  %v2753_v14 = vpop.f32.mrb[34].mxu1 }
 0x2f1   : > { %v2701_v10 = vadd.f32 %v2700_v38, %v2699_v48  ;;  %v2754_v30 = vpop.f32.mrb[35].mxu1  ;;  %v2152_v59 = vadd.f32 %v2698_v8, %v5270_v58  ;;  %v3438_v48 = vld [vmem:[%s3729_s25 + $0x20] sm:$0xff] }
 0x2f2   : > { %v5272_v26 = vadd.f32 %v2754_v30, %v2753_v14  ;;  %v3439_v14 = vld [vmem:[%s3729_s25 + $0x38] sm:$0xff]  ;;  %v3440_v30 = vld [vmem:[%s3729_s25 + $0x28] sm:$0xff] }
 0x2f3   : > { %v2155_v1 = vadd.f32 %v2701_v10, %v5270_v58 }
 0x2f5   : > { %v2852_v9 = vpop.f32.mrb[36].mxu0 }
 0x2f6   : > { %v2321_v4 = vadd.f32 %v2852_v9, %v2160_v25  ;;  %v2756_v49 = vpop.f32.mrb[36].mxu1  ;;  %v2312_v19 = vpop.f32.mrb[37].mxu0  ;;  %v2192_v9 = vadd.f32 %v5249_v40, %v5270_v58  ;;  %v2187_v40 = vadd.f32 %v5247_v41, %v5270_v58 }
 0x2f7   : > { %v2313_v51 = vadd.f32 %v2312_v19, %v2152_v59  ;;  %v2757_v54 = vpop.f32.mrb[37].mxu1  ;;  %v2853_v57 = vpop.f32.mrb[38].mxu0 }
 0x2f8   : > { %v2441_v34 = vadd.f32 %v3433_v31, %v2321_v4  ;;  %v5279_v45 = vadd.f32 %v2757_v54, %v2756_v49  ;;  %v2324_v28 = vadd.f32 %v2853_v57, %v2163_v47  ;;  %v2759_v22 = vpop.f32.mrb[38].mxu1  ;;  %v2315_v55 = vpop.f32.mrb[39].mxu0  ;;  %v2184_v4 = vadd.f32 %v5245_v37, %v5270_v58  ;;  %v3441_v57 = vld [vmem:[%s3729_s25 + $0x50] sm:$0xff] }
 0x2f9   : > { %v2439_v23 = vadd.f32 %v3434_v18, %v2313_v51  ;;  %v2316_v20 = vadd.f32 %v2315_v55, %v2155_v1  ;;  %v2760_v33 = vpop.f32.mrb[39].mxu1  ;;  %v2195_v47 = vadd.f32 %v5251_v53, %v5270_v58  ;;  %v3443_v53 = vld [vmem:[%s3729_s25 + $0x58] sm:$0xff] }
 0x2fa   : > { %2473 = vst.msk [vmem:[%s5284_s21 + $0x10] sm:$0xff] %vm499_vm0, %v2441_v34  ;;  %v2442_v39 = vadd.f32 %v3435_v15, %v2324_v28  ;;  %v5289_v29 = vadd.f32 %v2760_v33, %v2759_v22  ;;  %v3442_v28 = vld [vmem:[%s3729_s25 + $0x40] sm:$0xff] }
 0x2fb   : > { %2471 = vst.msk [vmem:[%s5284_s21] sm:$0xff] %vm499_vm0, %v2439_v23  ;;  %v2440_v46 = vadd.f32 %v3436_v21, %v2316_v20  ;;  %v3444_v20 = vld [vmem:[%s3729_s25 + $0x48] sm:$0xff]  ;;  %v2208_v21 = vadd.f32 %v5257_v17, %v5270_v58 }
 0x2fc   : > { %2474 = vst.msk [vmem:[%s5284_s21 + $0x18] sm:$0xff] %vm499_vm0, %v2442_v39 }
 0x2fd   : > { %2472 = vst.msk [vmem:[%s5284_s21 + $0x8] sm:$0xff] %vm499_vm0, %v2440_v46  ;;  %v2856_v13 = vpop.f32.mrb[40].mxu0 }
 0x2fe   : > { %v2337_v7 = vadd.f32 %v2856_v13, %v2176_v36  ;;  %v2762_v6 = vpop.f32.mrb[40].mxu1  ;;  %v2328_v3 = vpop.f32.mrb[41].mxu0  ;;  %v2200_v13 = vadd.f32 %v5253_v50, %v5270_v58 }
 0x2ff   : > { %v2329_v16 = vadd.f32 %v2328_v3, %v2168_v43  ;;  %v2763_v27 = vpop.f32.mrb[41].mxu1  ;;  %v2857_v63 = vpop.f32.mrb[42].mxu0 }
 0x300   : > { %v2445_v0 = vadd.f32 %v3437_v52, %v2337_v7  ;;  %v5307_v24 = vadd.f32 %v2763_v27, %v2762_v6  ;;  %v2340_v5 = vadd.f32 %v2857_v63, %v2179_v44  ;;  %v2765_v2 = vpop.f32.mrb[42].mxu1  ;;  %v2331_v8 = vpop.f32.mrb[43].mxu0  ;;  %v2211_v6 = vadd.f32 %v5259_v60, %v5270_v58  ;;  %v3446_v52 = vld [vmem:[%s3729_s25 + $0x60] sm:$0xff]  ;;  %v3448_v60 = vld [vmem:[%s3729_s25 + $0x68] sm:$0xff] }
 0x301   : > { %v2443_v12 = vadd.f32 %v3438_v48, %v2329_v16  ;;  %v2332_v56 = vadd.f32 %v2331_v8, %v2171_v42  ;;  %v2766_v38 = vpop.f32.mrb[43].mxu1  ;;  %v2203_v44 = vadd.f32 %v5255_v35, %v5270_v58  ;;  %v3445_v16 = vld [vmem:[%s3729_s25 + $0x70] sm:$0xff]  ;;  %v2224_v35 = vadd.f32 %v5265_v32, %v5270_v58 }
 0x302   : > { %2477 = vst.msk [vmem:[%s5284_s21 + $0x30] sm:$0xff] %vm499_vm0, %v2445_v0  ;;  %v2446_v10 = vadd.f32 %v3439_v14, %v2340_v5  ;;  %v5313_v62 = vadd.f32 %v2766_v38, %v2765_v2  ;;  %v3447_v5 = vld [vmem:[%s3729_s25 + $0x78] sm:$0xff]  ;;  %v2227_v14 = vadd.f32 %v5272_v26, %v5270_v58  ;;  %v2219_v32 = vadd.f32 %v5263_v61, %v5270_v58 }
 0x303   : > { %2475 = vst.msk [vmem:[%s5284_s21 + $0x20] sm:$0xff] %vm499_vm0, %v2443_v12  ;;  %v2444_v25 = vadd.f32 %v3440_v30, %v2332_v56  ;;  %v2216_v12 = vadd.f32 %v5261_v11, %v5270_v58 }
 0x304   : > { %2478 = vst.msk [vmem:[%s5284_s21 + $0x38] sm:$0xff] %vm499_vm0, %v2446_v10 }
 0x305   : > { %2476 = vst.msk [vmem:[%s5284_s21 + $0x28] sm:$0xff] %vm499_vm0, %v2444_v25  ;;  %v2860_v59 = vpop.f32.mrb[44].mxu0  ;;  %v3449_v25 = vld [vmem:[%s3729_s25 + $0x90] sm:$0xff] }
 0x306   : > { %v2353_v49 = vadd.f32 %v2860_v59, %v2192_v9  ;;  %v2344_v19 = vpop.f32.mrb[45].mxu0 }
 0x307   : > { %v2345_v51 = vadd.f32 %v2344_v19, %v2184_v4  ;;  %v2861_v54 = vpop.f32.mrb[46].mxu0 }
 0x308   : > { %v2449_v1 = vadd.f32 %v3441_v57, %v2353_v49  ;;  %v2356_v31 = vadd.f32 %v2861_v54, %v2195_v47  ;;  %v2347_v34 = vpop.f32.mrb[47].mxu0  ;;  %v3450_v49 = vld [vmem:[%s3729_s25 + $0x80] sm:$0xff]  ;;  %v3451_v47 = vld [vmem:[%s3729_s25 + $0x98] sm:$0xff]  ;;  %v3452_v54 = vld [vmem:[%s3729_s25 + $0x88] sm:$0xff] }
 0x309   : > { %v2447_v37 = vadd.f32 %v3442_v28, %v2345_v51  ;;  %v2348_v22 = vadd.f32 %v2347_v34, %v2187_v40  ;;  %v2768_v55 = vpop.f32.mrb[44].mxu1 }
 0x30a   : > { %2481 = vst.msk [vmem:[%s5284_s21 + $0x50] sm:$0xff] %vm499_vm0, %v2449_v1  ;;  %v2450_v18 = vadd.f32 %v3443_v53, %v2356_v31  ;;  %v2769_v23 = vpop.f32.mrb[45].mxu1  ;;  %v2240_v31 = vadd.f32 %v5307_v24, %v5270_v58 }
 0x30b   : > { %2479 = vst.msk [vmem:[%s5284_s21 + $0x40] sm:$0xff] %vm499_vm0, %v2447_v37  ;;  %v2448_v33 = vadd.f32 %v3444_v20, %v2348_v22  ;;  %v5338_v41 = vadd.f32 %v2769_v23, %v2768_v55  ;;  %v2771_v15 = vpop.f32.mrb[46].mxu1  ;;  %v2232_v37 = vadd.f32 %v5279_v45, %v5270_v58  ;;  %v2235_v20 = vadd.f32 %v5289_v29, %v5270_v58 }
 0x30c   : > { %2482 = vst.msk [vmem:[%s5284_s21 + $0x58] sm:$0xff] %vm499_vm0, %v2450_v18  ;;  %v2772_v39 = vpop.f32.mrb[47].mxu1  ;;  %v2243_v18 = vadd.f32 %v5313_v62, %v5270_v58  ;;  %v3456_v62 = vld [vmem:[%s3729_s25 + $0xa8] sm:$0xff] }
 0x30d   : > { %2480 = vst.msk [vmem:[%s5284_s21 + $0x48] sm:$0xff] %vm499_vm0, %v2448_v33  ;;  %v5346_v46 = vadd.f32 %v2772_v39, %v2771_v15  ;;  %v2864_v36 = vpop.f32.mrb[48].mxu0  ;;  %v3453_v33 = vld [vmem:[%s3729_s25 + $0xb0] sm:$0xff] }
 0x30e   : > { %v2369_v43 = vadd.f32 %v2864_v36, %v2208_v21  ;;  %v2360_v7 = vpop.f32.mrb[49].mxu0  ;;  %v3454_v21 = vld [vmem:[%s3729_s25 + $0xa0] sm:$0xff] }
 0x30f   : > { %v2361_v3 = vadd.f32 %v2360_v7, %v2200_v13  ;;  %v2865_v17 = vpop.f32.mrb[50].mxu0 }
 0x310   : > { %v2453_v27 = vadd.f32 %v3445_v16, %v2369_v43  ;;  %v2372_v63 = vadd.f32 %v2865_v17, %v2211_v6  ;;  %v2363_v42 = vpop.f32.mrb[51].mxu0  ;;  %v3455_v43 = vld [vmem:[%s3729_s25 + $0xb8] sm:$0xff] }
 0x311   : > { %v2451_v50 = vadd.f32 %v3446_v52, %v2361_v3  ;;  %v2364_v0 = vadd.f32 %v2363_v42, %v2203_v44 }
 0x312   : > { %2485 = vst.msk [vmem:[%s5284_s21 + $0x70] sm:$0xff] %vm499_vm0, %v2453_v27  ;;  %v2454_v2 = vadd.f32 %v3447_v5, %v2372_v63  ;;  %v2248_v63 = vadd.f32 %v5338_v41, %v5270_v58 }
 0x313   : > { %2483 = vst.msk [vmem:[%s5284_s21 + $0x60] sm:$0xff] %vm499_vm0, %v2451_v50  ;;  %v2452_v8 = vadd.f32 %v3448_v60, %v2364_v0 }
 0x314   : > { %2486 = vst.msk [vmem:[%s5284_s21 + $0x78] sm:$0xff] %vm499_vm0, %v2454_v2 }
 0x315   : > { %2484 = vst.msk [vmem:[%s5284_s21 + $0x68] sm:$0xff] %vm499_vm0, %v2452_v8  ;;  %v2868_v48 = vpop.f32.mrb[52].mxu0  ;;  %v2251_v8 = vadd.f32 %v5346_v46, %v5270_v58 }
 0x316   : > { %v2385_v56 = vadd.f32 %v2868_v48, %v2224_v35  ;;  %v2376_v38 = vpop.f32.mrb[53].mxu0  ;;  %v3457_v35 = vld [vmem:[%s3729_s25 + $0xd0] sm:$0xff] }
 0x317   : > { %v2377_v10 = vadd.f32 %v2376_v38, %v2216_v12  ;;  %v2869_v30 = vpop.f32.mrb[54].mxu0 }
 0x318   : > { %v2457_v9 = vadd.f32 %v3449_v25, %v2385_v56  ;;  %v2388_v59 = vadd.f32 %v2869_v30, %v2227_v14  ;;  %v2379_v4 = vpop.f32.mrb[55].mxu0  ;;  %v3458_v56 = vld [vmem:[%s3729_s25 + $0xc0] sm:$0xff] }
 0x319   : > { %v2455_v11 = vadd.f32 %v3450_v49, %v2377_v10  ;;  %v2380_v19 = vadd.f32 %v2379_v4, %v2219_v32  ;;  %v3459_v10 = vld [vmem:[%s3729_s25 + $0xd8] sm:$0xff]  ;;  %v3460_v32 = vld [vmem:[%s3729_s25 + $0xc8] sm:$0xff] }
 0x31a   : > { %2489 = vst.msk [vmem:[%s5284_s21 + $0x90] sm:$0xff] %vm499_vm0, %v2457_v9  ;;  %v2458_v51 = vadd.f32 %v3451_v47, %v2388_v59  ;;  %v2774_v26 = vpop.f32.mrb[48].mxu1 }
 0x31b   : > { %2487 = vst.msk [vmem:[%s5284_s21 + $0x80] sm:$0xff] %vm499_vm0, %v2455_v11  ;;  %v2456_v40 = vadd.f32 %v3452_v54, %v2380_v19  ;;  %v2775_v57 = vpop.f32.mrb[49].mxu1 }
 0x31c   : > { %2490 = vst.msk [vmem:[%s5284_s21 + $0x98] sm:$0xff] %vm499_vm0, %v2458_v51  ;;  %v2776_v61 = vadd.f32 %v2775_v57, %v2774_v26  ;;  %v2777_v1 = vpop.f32.mrb[50].mxu1 }
 0x31d   : > { %2488 = vst.msk [vmem:[%s5284_s21 + $0x88] sm:$0xff] %vm499_vm0, %v2456_v40  ;;  %v2778_v34 = vpop.f32.mrb[51].mxu1  ;;  %v2872_v28 = vpop.f32.mrb[56].mxu0 }
 0x31e   : > { %v2779_v22 = vadd.f32 %v2778_v34, %v2777_v1  ;;  %v2401_v55 = vadd.f32 %v2872_v28, %v2240_v31  ;;  %v2392_v53 = vpop.f32.mrb[57].mxu0  ;;  %v2256_v17 = vadd.f32 %v2776_v61, %v5270_v58  ;;  %v3461_v31 = vld [vmem:[%s3729_s25 + $0xe0] sm:$0xff] }
 0x31f   : > { %v2393_v23 = vadd.f32 %v2392_v53, %v2232_v37  ;;  %v2873_v24 = vpop.f32.mrb[58].mxu0 }
 0x320   : > { %v2461_v15 = vadd.f32 %v3453_v33, %v2401_v55  ;;  %v2404_v39 = vadd.f32 %v2873_v24, %v2243_v18  ;;  %v2395_v45 = vpop.f32.mrb[59].mxu0  ;;  %v2259_v0 = vadd.f32 %v2779_v22, %v5270_v58  ;;  %v3462_v22 = vld [vmem:[%s3729_s25 + $0xf0] sm:$0xff]  ;;  %v3463_v18 = vld [vmem:[%s3729_s25 + $0xe8] sm:$0xff] }
 0x321   : > { %v2459_v36 = vadd.f32 %v3454_v21, %v2393_v23  ;;  %v2396_v13 = vadd.f32 %v2395_v45, %v2235_v20 }
 0x322   : > { %2493 = vst.msk [vmem:[%s5284_s21 + $0xb0] sm:$0xff] %vm499_vm0, %v2461_v15  ;;  %v2462_v7 = vadd.f32 %v3455_v43, %v2404_v39 }
 0x323   : > { %2491 = vst.msk [vmem:[%s5284_s21 + $0xa0] sm:$0xff] %vm499_vm0, %v2459_v36  ;;  %v2460_v6 = vadd.f32 %v3456_v62, %v2396_v13  ;;  %v2780_v3 = vpop.f32.mrb[52].mxu1 }
 0x324   : > { %2494 = vst.msk [vmem:[%s5284_s21 + $0xb8] sm:$0xff] %vm499_vm0, %v2462_v7  ;;  %v2781_v29 = vpop.f32.mrb[53].mxu1 }
 0x325   : > { %2492 = vst.msk [vmem:[%s5284_s21 + $0xa8] sm:$0xff] %vm499_vm0, %v2460_v6  ;;  %v2782_v44 = vadd.f32 %v2781_v29, %v2780_v3  ;;  %v2783_v16 = vpop.f32.mrb[54].mxu1  ;;  %v2876_v27 = vpop.f32.mrb[60].mxu0 }
 0x326   : > { %v2417_v42 = vadd.f32 %v2876_v27, %v2256_v17  ;;  %v2784_v52 = vpop.f32.mrb[55].mxu1  ;;  %v2408_v50 = vpop.f32.mrb[61].mxu0 }
 0x327   : > { %v2785_v5 = vadd.f32 %v2784_v52, %v2783_v16  ;;  %v2409_v2 = vadd.f32 %v2408_v50, %v2248_v63  ;;  %v2877_v60 = vpop.f32.mrb[62].mxu0  ;;  %v2264_v11 = vadd.f32 %v2782_v44, %v5270_v58 }
 0x328   : > { %v2465_v48 = vadd.f32 %v3457_v35, %v2417_v42  ;;  %v2420_v41 = vadd.f32 %v2877_v60, %v2259_v0  ;;  %v2411_v12 = vpop.f32.mrb[63].mxu0 }
 0x329   : > { %v2463_v38 = vadd.f32 %v3458_v56, %v2409_v2  ;;  %v2412_v14 = vadd.f32 %v2411_v12, %v2251_v8  ;;  %v2267_v57 = vadd.f32 %v2785_v5, %v5270_v58 }
 0x32a   : > { %2497 = vst.msk [vmem:[%s5284_s21 + $0xd0] sm:$0xff] %vm499_vm0, %v2465_v48  ;;  %v2466_v30 = vadd.f32 %v3459_v10, %v2420_v41 }
 0x32b   : > { %2495 = vst.msk [vmem:[%s5284_s21 + $0xc0] sm:$0xff] %vm499_vm0, %v2463_v38  ;;  %v2464_v25 = vadd.f32 %v3460_v32, %v2412_v14  ;;  %v2786_v9 = vpop.f32.mrb[56].mxu1 }
 0x32c   : > { %2498 = vst.msk [vmem:[%s5284_s21 + $0xd8] sm:$0xff] %vm499_vm0, %v2466_v30  ;;  %v2787_v46 = vpop.f32.mrb[57].mxu1 }
 0x32d   : > { %2496 = vst.msk [vmem:[%s5284_s21 + $0xc8] sm:$0xff] %vm499_vm0, %v2464_v25  ;;  %v2788_v59 = vadd.f32 %v2787_v46, %v2786_v9  ;;  %v2789_v4 = vpop.f32.mrb[58].mxu1  ;;  %v2880_v49 = vpop.f32.mrb[64].mxu0 }
 0x32e   : > { %v2790_v19 = vpop.f32.mrb[59].mxu1  ;;  %v2424_v47 = vpop.f32.mrb[65].mxu0 }
 0x32f   : > { %v2272_v51 = vadd.f32 %v2788_v59, %v5270_v58  ;;  %v2791_v26 = vadd.f32 %v2790_v19, %v2789_v4  ;;  %v2425_v54 = vadd.f32 %v2424_v47, %v2264_v11  ;;  %v2881_v40 = vpop.f32.mrb[66].mxu0 }
 0x330   : > { %v2427_v61 = vpop.f32.mrb[67].mxu0 }
 0x331   : > { %v2433_v1 = vadd.f32 %v2880_v49, %v2272_v51  ;;  %v2467_v34 = vadd.f32 %v3461_v31, %v2425_v54  ;;  %v2275_v28 = vadd.f32 %v2791_v26, %v5270_v58  ;;  %v2428_v37 = vadd.f32 %v2427_v61, %v2267_v57  ;;  %v3464_v58 = vld [vmem:[%s3729_s25 + $0xf8] sm:$0xff] }
 0x333   : > { %v2469_v55 = vadd.f32 %v3462_v22, %v2433_v1  ;;  %2499 = vst.msk [vmem:[%s5284_s21 + $0xe0] sm:$0xff] %vm499_vm0, %v2467_v34  ;;  %v2436_v53 = vadd.f32 %v2881_v40, %v2275_v28  ;;  %v2468_v23 = vadd.f32 %v3463_v18, %v2428_v37 }
 0x335   : > { %2501 = vst.msk [vmem:[%s5284_s21 + $0xf0] sm:$0xff] %vm499_vm0, %v2469_v55  ;;  %v2470_v24 = vadd.f32 %v3464_v58, %v2436_v53  ;;  %2500 = vst.msk [vmem:[%s5284_s21 + $0xe8] sm:$0xff] %vm499_vm0, %v2468_v23 }
 0x337   : > { %2502 = vst.msk [vmem:[%s5284_s21 + $0xf8] sm:$0xff] %vm499_vm0, %v2470_v24 }
 0x338   : > { %3508 = shalt.err (!%p3505_p2)
}
 0x339   : > { %s3509_s25 = scalar_lea.hbm %s5438_s12, 4096  ;;  %s3513_s23 = scalar_lea.hbm %s5499_s8, 8192 }
 0x33a   : > { %p3510_p4 = scmp.ne.s32.totalorder %s5438_s12, %s3509_s25  ;;  %p3514_p9 = scmp.lt.u32.totalorder %s5438_s12, %s5499_s8 }
 0x33b   : > { %p3515_p1 = scmp.lt.u32.totalorder %s3513_s23, %s3509_s25  ;;  %p3517_p6 = scmp.lt.u32.totalorder %s3509_s25, %s5438_s12 }
 0x33c   : > { %p3511_p5 = pnand %p3510_p4, %p5708_p11 }
 0x33d   : > { %p3516_p3 = por %p3515_p1, %p3514_p9 }
 0x33e   : > { %p3512_p7 = pneg %p3511_p5 }
 0x33f   : > { %p3518_p12 = por %p3517_p6, %p3516_p3 }
 0x341   : > { %p3519_p13 = pnand %p3518_p12, %p3512_p7 }
 0x343   : > { %3522 = shalt.err (!%p3519_p13)
}
 0x344   : > { %s3572_s15 = smov 128   ;;  %s3573_s16 = smov 8  }
 0x345   : > { %2900 = dma.vmem_to_hbm [thread:$0]  (%p5708_p11), %s5440_s19, 4096, %s5438_s12, %s2504_s9, %s3572_s15, %s3572_s15, %s3573_s16  }
 0x346 PF: > { %s2532_s20 = sand.u32 1, %s3549_s27   ;;  %p5709_p8 = scmp.ne.s32.totalorder %s5568_s18, 0 }
 0x347   : > { %p5710_p10 = scmp.ge.s32.totalorder %s3561_s30, 2  ;;  %s2533_s10 = scalar_lea.sflag [#allocation4], %s2532_s20 }
 0x349   : > { %p2907_p0 = pnand %p5710_p10, %p5709_p8 }
 0x34b   : > { %3544 = dma.done.wait (!%p2907_p0), %s2533_s10, 4096  }
 0x34c   : > { %3546 = vsyncadd (!%p2907_p0), %s2533_s10, 4294963200  ;;  %p21_p2 = scmp.ge.s32.totalorder %s3644_s11, 4   ;;  %s5711_s27 = smov %s3553_s28 }
 0x34d   : > { %s5712_s28 = smov %s3557_s29  ;;  %s5713_s29 = smov %s3656_s14 }
 0x34e   : > { %s5714_s30 = smov %s3644_s11  ;;  %23 = sbr.rel (!%p21_p2) target bundleno = 5 (0x5), region = 97 }
 0x355   :  { %2538 = vsyncpa [#allocation3], 1 }
 0x356   :  { %2540 = vsyncpa [#allocation3 + $0x1], 1 }
 0x357   :  { %2541 = vsyncpa [#allocation4], 1 }
 0x358   :  { %2543 = vsyncpa [#allocation4 + $0x1], 1 }

</bundles_post_ra>
